<compile_context>
chip_gen: v7x
topology: tpu7x:2x2x1
jax: 0.10.0
libtpu: 0.0.40
codegen_flags: <defaults>
</compile_context>

<pallas_src>
import functools

import jax
import jax.numpy as jnp
from jax import lax
from jax.experimental import pallas as pl
from jax.experimental.pallas import tpu as pltpu


def _upsample_conv_kernel(H, W, C, x_ref, w_ref, b_ref, out_ref, xpad_ref):
    """One batch element per grid step.

    x_ref:    (1, H, W, C)     original-resolution NHWC input
    w_ref:    (9*C, 4*Cp)      parity-folded, im2col-flattened conv weights
    b_ref:    (1, 4*Cp)        bias replicated per parity, zero-padded to Cp
    out_ref:  (1, H*W, 4*Cp)   lane-dense output slab (depth-to-space pending)
    xpad_ref: (H+2, W+2, C)    VMEM scratch: 1-px zero-padded input
    """
    # 1-pixel zero pad of x in VMEM (tiny; re-zeroed every step so it is
    # correct under megacore-parallel grid splitting).
    xpad_ref[...] = jnp.zeros_like(xpad_ref)
    xpad_ref[1:H + 1, 1:W + 1, :] = x_ref[0]

    # im2col: one (H*W, 9*C) slab -> a single MXU matmul with K = 9*C.
    cols = jnp.concatenate(
        [xpad_ref[ty:ty + H, tx:tx + W, :]
         for ty in range(3) for tx in range(3)],
        axis=-1,
    ).reshape(H * W, 9 * C)

    out = jnp.dot(cols, w_ref[...], preferred_element_type=jnp.float32)
    out_ref[0] = (out + b_ref[...]).astype(out_ref.dtype)


def _fold_upsample_into_weights(w_hwio, b, cout_pad):
    """Fold the nearest-2x upsample into the 3x3 conv weights.

    Returns (9*Cin, 4*cout_pad) weights and (1, 4*cout_pad) bias; the four
    output-channel blocks correspond to output parities (a, b) = (row%2, col%2).
    """
    Cin, Cout = w_hwio.shape[2], w_hwio.shape[3]
    # R[a][t, dy] = 1 iff, for output-row parity `a`, conv tap dy reads the
    # original-resolution row i + (t - 1)   (t in {0,1,2} <-> offset {-1,0,+1}).
    R = jnp.array(
        [[[1, 0, 0], [0, 1, 1], [0, 0, 0]],
         [[0, 0, 0], [1, 1, 0], [0, 0, 1]]], jnp.float32)
    b_row = b.reshape(1, Cout).astype(jnp.float32)
    w_blocks, b_blocks = [], []
    for a in range(2):
        for c in range(2):
            w_eff = jnp.einsum("td,se,deio->tsio", R[a], R[c],
                               w_hwio.astype(jnp.float32))   # (3,3,Cin,Cout)
            w_blocks.append(jnp.pad(w_eff.reshape(9 * Cin, Cout),
                                    ((0, 0), (0, cout_pad - Cout))))
            b_blocks.append(jnp.pad(b_row, ((0, 0), (0, cout_pad - Cout))))
    return jnp.concatenate(w_blocks, axis=1), jnp.concatenate(b_blocks, axis=1)


def upsample_forward(x_nchw, w_hwio, b):
    """out = Conv2d(dim, dim, 3, padding=1)(Upsample(scale=2, 'nearest')(x))."""
    N, C, H, W = x_nchw.shape
    Cout = w_hwio.shape[-1]
    cout_pad = ((Cout + 31) // 32) * 32      # 4*cout_pad is a multiple of 128
    NP = 4 * cout_pad

    w_all, b_all = _fold_upsample_into_weights(w_hwio, b, cout_pad)
    x = jnp.transpose(x_nchw, (0, 2, 3, 1))  # NCHW -> NHWC

    kernel = functools.partial(_upsample_conv_kernel, H, W, C)
    out_k = pl.pallas_call(
        kernel,
        out_shape=jax.ShapeDtypeStruct((N, H * W, NP), jnp.float32),
        grid=(N,),
        in_specs=[
            pl.BlockSpec((1, H, W, C), lambda n: (n, 0, 0, 0)),
            pl.BlockSpec((9 * C, NP), lambda n: (0, 0)),
            pl.BlockSpec((1, NP), lambda n: (0, 0)),
        ],
        out_specs=pl.BlockSpec((1, H * W, NP), lambda n: (n, 0, 0)),
        scratch_shapes=[pltpu.VMEM((H + 2, W + 2, C), jnp.float32)],
        compiler_params=pltpu.CompilerParams(dimension_semantics=("parallel",)),
    )(x, w_all, b_all)

    # Depth-to-space + NCHW layout plumbing in the wrapper (kernel store stays
    # lane-dense).  out_k[n, i*W + j, (a*2+b)*cout_pad + c] = out[n, c, 2i+a, 2j+b].
    y = out_k.reshape(N, H, W, 2, 2, cout_pad)[..., :Cout]   # (N, i, j, a, b, c)
    y = jnp.transpose(y, (0, 1, 3, 2, 4, 5)).reshape(N, 2 * H, 2 * W, Cout)
    return jnp.transpose(y, (0, 3, 1, 2))                    # -> NCHW


def ref_forward(x_nchw, w_hwio, b):
    """Pure-JAX reference matching the PyTorch forward."""
    x = jnp.transpose(x_nchw, (0, 2, 3, 1))
    up = jnp.repeat(jnp.repeat(x, 2, axis=1), 2, axis=2)     # nearest 2x
    y = lax.conv_general_dilated(up, w_hwio, (1, 1), "SAME",
                                 dimension_numbers=("NHWC", "HWIO", "NHWC"))
    y = y + b.reshape(1, 1, 1, -1)
    return jnp.transpose(y, (0, 3, 1, 2))


if __name__ == "__main__":
    # Upsample(dim=16) on a (2, 16, 16, 16) input -> (2, 16, 32, 32) output.
    N, C, H, W = 2, 16, 16, 16
    key = jax.random.PRNGKey(0)
    kx, kw, kb = jax.random.split(key, 3)
    x = jax.random.normal(kx, (N, C, H, W), jnp.float32)
    w = 0.1 * jax.random.normal(kw, (3, 3, C, C), jnp.float32)   # HWIO
    b = 0.1 * jax.random.normal(kb, (C,), jnp.float32)

    out = jax.jit(upsample_forward)(x, w, b)
    jax.block_until_ready(out)

    ref = ref_forward(x, w, b)
    assert out.shape == (N, C, 2 * H, 2 * W), out.shape
    max_err = jnp.max(jnp.abs(out - ref))
    assert jnp.allclose(out, ref, atol=1e-3, rtol=1e-3), f"max abs err {max_err}"
    print("KERNEL_OK")
</pallas_src>

<mosaic_0001>
module attributes {stable_mosaic.version = 11 : i64} {
  func.func @_upsample_conv_kernel(%arg0: i32, %arg1: memref<1x16x16x16xf32, #tpu.memory_space<vmem>>, %arg2: memref<144x128xf32, #tpu.memory_space<vmem>>, %arg3: memref<1x128xf32, #tpu.memory_space<vmem>>, %arg4: memref<1x256x128xf32, #tpu.memory_space<vmem>>, %arg5: memref<18x18x16xf32, #tpu.memory_space<vmem>>) attributes {dimension_semantics = [#tpu.dimension_semantics<parallel>], iteration_bounds = array<i64: 2>, scalar_prefetch = 0 : i64, scratch_operands = 1 : i64, tpu.core_type = #tpu.core_type<tc>, window_params = [{transform_indices = @transform_0, window_bounds = array<i64: 1, 16, 16, 16>}, {pipeline_mode = #tpu.pipeline_mode<synchronous>, transform_indices = @transform_1, window_bounds = array<i64: 144, 128>}, {pipeline_mode = #tpu.pipeline_mode<synchronous>, transform_indices = @transform_2, window_bounds = array<i64: 1, 128>}, {transform_indices = @transform_3, window_bounds = array<i64: 1, 256, 128>}]} {
    %cst = arith.constant 0.000000e+00 : f32
    %0 = vector.broadcast %cst : f32 to vector<18x18x16xf32>
    %c0 = arith.constant 0 : index
    %c0_0 = arith.constant 0 : index
    %c0_1 = arith.constant 0 : index
    %1 = vector.load %arg5[%c0, %c0_0, %c0_1] : memref<18x18x16xf32, #tpu.memory_space<vmem>>, vector<18x18x16xf32>
    tpu.vector_store %arg5[%c0, %c0_0, %c0_1], %0 {strides = array<i32>} : memref<18x18x16xf32, #tpu.memory_space<vmem>>, vector<18x18x16xf32>,
    %c0_2 = arith.constant 0 : index
    %c0_3 = arith.constant 0 : index
    %c0_4 = arith.constant 0 : index
    %c0_5 = arith.constant 0 : index
    %2 = vector.load %arg1[%c0_2, %c0_3, %c0_4, %c0_5] : memref<1x16x16x16xf32, #tpu.memory_space<vmem>>, vector<1x16x16x16xf32>
    %3 = vector.shape_cast %2 : vector<1x16x16x16xf32> to vector<16x16x16xf32>
    %c1 = arith.constant 1 : index
    %c1_6 = arith.constant 1 : index
    %c0_7 = arith.constant 0 : index
    %4 = vector.load %arg5[%c1, %c1_6, %c0_7] : memref<18x18x16xf32, #tpu.memory_space<vmem>>, vector<16x16x16xf32>
    tpu.vector_store %arg5[%c1, %c1_6, %c0_7], %3 {strides = array<i32>} : memref<18x18x16xf32, #tpu.memory_space<vmem>>, vector<16x16x16xf32>,
    %c0_8 = arith.constant 0 : index
    %c0_9 = arith.constant 0 : index
    %c0_10 = arith.constant 0 : index
    %5 = vector.load %arg5[%c0_8, %c0_9, %c0_10] : memref<18x18x16xf32, #tpu.memory_space<vmem>>, vector<16x16x16xf32>
    %c0_11 = arith.constant 0 : index
    %c1_12 = arith.constant 1 : index
    %c0_13 = arith.constant 0 : index
    %6 = vector.load %arg5[%c0_11, %c1_12, %c0_13] : memref<18x18x16xf32, #tpu.memory_space<vmem>>, vector<16x16x16xf32>
    %c0_14 = arith.constant 0 : index
    %c2 = arith.constant 2 : index
    %c0_15 = arith.constant 0 : index
    %7 = vector.load %arg5[%c0_14, %c2, %c0_15] : memref<18x18x16xf32, #tpu.memory_space<vmem>>, vector<16x16x16xf32>
    %c1_16 = arith.constant 1 : index
    %c0_17 = arith.constant 0 : index
    %c0_18 = arith.constant 0 : index
    %8 = vector.load %arg5[%c1_16, %c0_17, %c0_18] : memref<18x18x16xf32, #tpu.memory_space<vmem>>, vector<16x16x16xf32>
    %c1_19 = arith.constant 1 : index
    %c1_20 = arith.constant 1 : index
    %c0_21 = arith.constant 0 : index
    %9 = vector.load %arg5[%c1_19, %c1_20, %c0_21] : memref<18x18x16xf32, #tpu.memory_space<vmem>>, vector<16x16x16xf32>
    %c1_22 = arith.constant 1 : index
    %c2_23 = arith.constant 2 : index
    %c0_24 = arith.constant 0 : index
    %10 = vector.load %arg5[%c1_22, %c2_23, %c0_24] : memref<18x18x16xf32, #tpu.memory_space<vmem>>, vector<16x16x16xf32>
    %c2_25 = arith.constant 2 : index
    %c0_26 = arith.constant 0 : index
    %c0_27 = arith.constant 0 : index
    %11 = vector.load %arg5[%c2_25, %c0_26, %c0_27] : memref<18x18x16xf32, #tpu.memory_space<vmem>>, vector<16x16x16xf32>
    %c2_28 = arith.constant 2 : index
    %c1_29 = arith.constant 1 : index
    %c0_30 = arith.constant 0 : index
    %12 = vector.load %arg5[%c2_28, %c1_29, %c0_30] : memref<18x18x16xf32, #tpu.memory_space<vmem>>, vector<16x16x16xf32>
    %c2_31 = arith.constant 2 : index
    %c2_32 = arith.constant 2 : index
    %c0_33 = arith.constant 0 : index
    %13 = vector.load %arg5[%c2_31, %c2_32, %c0_33] : memref<18x18x16xf32, #tpu.memory_space<vmem>>, vector<16x16x16xf32>
    %14 = tpu.concatenate %5, %6, %7, %8, %9, %10, %11, %12, %13 in 2 : vector<16x16x16xf32>, vector<16x16x16xf32>, vector<16x16x16xf32>, vector<16x16x16xf32>, vector<16x16x16xf32>, vector<16x16x16xf32>, vector<16x16x16xf32>, vector<16x16x16xf32>, vector<16x16x16xf32> -> vector<16x16x144xf32>
    %15 = vector.shape_cast %14 : vector<16x16x144xf32> to vector<256x144xf32>
    %c0_34 = arith.constant 0 : index
    %c0_35 = arith.constant 0 : index
    %16 = vector.load %arg2[%c0_34, %c0_35] : memref<144x128xf32, #tpu.memory_space<vmem>>, vector<144x128xf32>
    %cst_36 = arith.constant dense<0.000000e+00> : vector<256x128xf32>
    %17 = tpu.matmul %15, %16, %cst_36 {dimension_numbers = #tpu.dot_dimension_numbers<[1], [0], [0], [1], [0, 0, 1, 1], [], []>} : vector<256x144xf32>, vector<144x128xf32>, vector<256x128xf32> -> vector<256x128xf32>
    %c0_37 = arith.constant 0 : index
    %c0_38 = arith.constant 0 : index
    %18 = vector.load %arg3[%c0_37, %c0_38] : memref<1x128xf32, #tpu.memory_space<vmem>>, vector<1x128xf32>
    %19 = vector.broadcast %18 : vector<1x128xf32> to vector<256x128xf32>
    %20 = arith.addf %17, %19 : vector<256x128xf32>
    %c0_39 = arith.constant 0 : index
    %c0_40 = arith.constant 0 : index
    %c0_41 = arith.constant 0 : index
    %21 = vector.load %arg4[%c0_39, %c0_40, %c0_41] : memref<1x256x128xf32, #tpu.memory_space<vmem>>, vector<1x256x128xf32>
    %22 = vector.shape_cast %21 : vector<1x256x128xf32> to vector<256x128xf32>
    %23 = vector.shape_cast %20 : vector<256x128xf32> to vector<1x256x128xf32>
    tpu.vector_store %arg4[%c0_39, %c0_40, %c0_41], %23 {strides = array<i32>} : memref<1x256x128xf32, #tpu.memory_space<vmem>>, vector<1x256x128xf32>,
    return
  }
  func.func @transform_0(%arg0: i32) -> (i32, i32, i32, i32) {
    %c0_i32 = arith.constant 0 : i32
    %c0_i32_0 = arith.constant 0 : i32
    %c0_i32_1 = arith.constant 0 : i32
    %c0_i32_2 = arith.constant 0 : i32
    return %arg0, %c0_i32, %c0_i32_0, %c0_i32_1 : i32, i32, i32, i32
  }
  func.func @transform_1(%arg0: i32) -> (i32, i32) {
    %c0_i32 = arith.constant 0 : i32
    %c0_i32_0 = arith.constant 0 : i32
    %c0_i32_1 = arith.constant 0 : i32
    return %c0_i32, %c0_i32_0 : i32, i32
  }
  func.func @transform_2(%arg0: i32) -> (i32, i32) {
    %c0_i32 = arith.constant 0 : i32
    %c0_i32_0 = arith.constant 0 : i32
    %c0_i32_1 = arith.constant 0 : i32
    return %c0_i32, %c0_i32_0 : i32, i32
  }
  func.func @transform_3(%arg0: i32) -> (i32, i32, i32) {
    %c0_i32 = arith.constant 0 : i32
    %c0_i32_0 = arith.constant 0 : i32
    %c0_i32_1 = arith.constant 0 : i32
    return %arg0, %c0_i32, %c0_i32_0 : i32, i32, i32
  }
}

</mosaic_0001>

<bundles_post_ra>
// kernel: upsample_forward.1
= control target key start
LH: loop header
LB: loop body
LE: loop exit
PB: predicated region body
PF: predicated region fallthrough
CT: control target
= control target key end

     0   :  { %s2859_s12 = smov 0   ;;  %s3944_s0 = inlined_call_operand.vmem [shape: f32[2,16,16,16], index: 0, kind: input, shape index: {}]   ;;  %s3945_s1 = inlined_call_operand.vmem [shape: f32[144,128], index: 1, kind: input, shape index: {}]   ;;  %s3946_s2 = inlined_call_operand.vmem [shape: f32[1,128], index: 2, kind: input, shape index: {}]   ;;  %s3947_s3 = inlined_call_operand.vmem [shape: f32[2,256,128], index: 3, kind: output, shape index: {}]  }
   0x1 LB: > { %s2140_s13 = sadd.s32 4294967295, %s2828_s12   ;;  %p2144_p0 = scmp.ge.s32.totalorder %s2828_s12, 1  ;;  %s2828_s12 = sphi %s2859_s12, %s13_s12  }
   0x2   : > { %p137_p1 = scmp.lt.s32.totalorder %s2828_s12, 3 }
   0x4   : > { %p138_p2 = pnand %p2144_p0, %p137_p1 }
   0x6   : > { %141 = sbr.rel (%p138_p2) target bundleno = 604 (0x25c), region = 32 }
   0xd   : > { %vm171_vm0 = vcmask 130048   ;;  %vm174_vm1 = vcmask 123904   ;;  %p2869_p3 = scmp.lt.s32.totalorder %s2140_s13, 1  ;;  %v2830_v0 = vmov 0.0   ;;  %s2831_s19 = smov 16   ;;  %vm1509_vm2 = vcmask 261120  }
   0xe   : > { %172 = vst.msk [vmem:[#allocation2] sm:$0xff] %vm171_vm0, %v2830_v0  ;;  %173 = vst.msk [vmem:[#allocation2 + $0x8] sm:$0xff] %vm171_vm0, %v2830_v0  ;;  %s2833_s20 = smov 32   ;;  %s2834_s29 = smov 48   ;;  %vm1542_vm3 = vcmask 392192   ;;  %vm1575_vm4 = vcmask 523264  }
   0xf   : > { %175 = vst.msk [vmem:[#allocation2 + $0x10] sm:$0x3] %vm174_vm1, %v2830_v0  ;;  %178 = vst.msk [vmem:[#allocation2 + $0x28] sm:$0x3] %vm174_vm1, %v2830_v0  ;;  %s3983_s13 = smov (!%p2869_p3, %s2140_s13), 1  ;;  %s2835_s5 = smov 64  }
  0x10   : > { %176 = vst.msk [vmem:[#allocation2 + $0x18] sm:$0xff] %vm171_vm0, %v2830_v0  ;;  %177 = vst.msk [vmem:[#allocation2 + $0x20] sm:$0xff] %vm171_vm0, %v2830_v0  ;;  %s2184_s15 = sshll.u32 %s3983_s13, 8  ;;  %s2836_s6 = smov 80   ;;  %vm1608_vm5 = vcmask 654336   ;;  %vm1641_vm6 = vcmask 785408  }
  0x11   : > { %179 = vst.msk [vmem:[#allocation2 + $0x30] sm:$0xff] %vm171_vm0, %v2830_v0  ;;  %180 = vst.msk [vmem:[#allocation2 + $0x38] sm:$0xff] %vm171_vm0, %v2830_v0  ;;  %s2939_s18 = scalar_lea.vmem %s3944_s0, %s2184_s15  ;;  %s2837_s11 = smov 96   ;;  %vm1674_vm7 = vcmask 916480  }
  0x12   : > { %181 = vst.msk [vmem:[#allocation2 + $0x40] sm:$0x3] %vm174_vm1, %v2830_v0  ;;  %184 = vst.msk [vmem:[#allocation2 + $0x58] sm:$0x3] %vm174_vm1, %v2830_v0  ;;  %v229_v1 = vld [vmem:[%s2939_s18 + $0x10] sm:$0xff]  ;;  %v230_v2 = vld [vmem:[%s2939_s18 + $0x18] sm:$0xff] }
  0x13   : > { %182 = vst.msk [vmem:[#allocation2 + $0x48] sm:$0xff] %vm171_vm0, %v2830_v0  ;;  %183 = vst.msk [vmem:[#allocation2 + $0x50] sm:$0xff] %vm171_vm0, %v2830_v0  ;;  %v227_v3 = vld [vmem:[%s2939_s18] sm:$0xff]  ;;  %v228_v4 = vld [vmem:[%s2939_s18 + $0x8] sm:$0xff] }
  0x14   : > { %185 = vst.msk [vmem:[#allocation2 + $0x60] sm:$0xff] %vm171_vm0, %v2830_v0  ;;  %186 = vst.msk [vmem:[#allocation2 + $0x68] sm:$0xff] %vm171_vm0, %v2830_v0  ;;  %v231_v5 = vld [vmem:[%s2939_s18 + $0x20] sm:$0xff]  ;;  %v232_v6 = vld [vmem:[%s2939_s18 + $0x28] sm:$0xff] }
  0x15   : > { %187 = vst.msk [vmem:[#allocation2 + $0x70] sm:$0x3] %vm174_vm1, %v2830_v0  ;;  %190 = vst.msk [vmem:[#allocation2 + $0x88] sm:$0x3] %vm174_vm1, %v2830_v0  ;;  %v324_v7 = vld [vmem:[#allocation2 + $0x1] sm:$0xff]  ;;  %v233_v9 = vld [vmem:[%s2939_s18 + $0x30] sm:$0xff] }
  0x16   : > { %188 = vst.msk [vmem:[#allocation2 + $0x78] sm:$0xff] %vm171_vm0, %v2830_v0  ;;  %189 = vst.msk [vmem:[#allocation2 + $0x80] sm:$0xff] %vm171_vm0, %v2830_v0  ;;  %v325_v8 = vld [vmem:[#allocation2 + $0x9] sm:$0xff]  ;;  %v234_v11 = vld [vmem:[%s2939_s18 + $0x38] sm:$0xff] }
  0x17   : > { %191 = vst.msk [vmem:[#allocation2 + $0x90] sm:$0xff] %vm171_vm0, %v2830_v0  ;;  %192 = vst.msk [vmem:[#allocation2 + $0x98] sm:$0xff] %vm171_vm0, %v2830_v0  ;;  %v2248_v10 = vpack.i.bf16 %v325_v8, %v324_v7  ;;  %v235_v12 = vld [vmem:[%s2939_s18 + $0x40] sm:$0xff]  ;;  %v236_v13 = vld [vmem:[%s2939_s18 + $0x48] sm:$0xff] }
  0x18   : > { %193 = vst.msk [vmem:[#allocation2 + $0xa0] sm:$0x3] %vm174_vm1, %v2830_v0  ;;  %196 = vst.msk [vmem:[#allocation2 + $0xb8] sm:$0x3] %vm174_vm1, %v2830_v0  ;;  %v237_v14 = vld [vmem:[%s2939_s18 + $0x50] sm:$0xff]  ;;  %v238_v15 = vld [vmem:[%s2939_s18 + $0x58] sm:$0xff] }
  0x19   : > { %194 = vst.msk [vmem:[#allocation2 + $0xa8] sm:$0xff] %vm171_vm0, %v2830_v0  ;;  %195 = vst.msk [vmem:[#allocation2 + $0xb0] sm:$0xff] %vm171_vm0, %v2830_v0  ;;  %v239_v16 = vld [vmem:[%s2939_s18 + $0x60] sm:$0xff]  ;;  %2249 = vrot.lane.b32.xlu0 %v2248_v10, %s2831_s19  ;;  %v240_v17 = vld [vmem:[%s2939_s18 + $0x68] sm:$0xff] }
  0x1a   : > { %197 = vst.msk [vmem:[#allocation2 + $0xc0] sm:$0xff] %vm171_vm0, %v2830_v0  ;;  %198 = vst.msk [vmem:[#allocation2 + $0xc8] sm:$0xff] %vm171_vm0, %v2830_v0  ;;  %v241_v18 = vld [vmem:[%s2939_s18 + $0x70] sm:$0xff]  ;;  %v242_v19 = vld [vmem:[%s2939_s18 + $0x78] sm:$0xff] }
  0x1b   : > { %199 = vst.msk [vmem:[#allocation2 + $0xd0] sm:$0x3] %vm174_vm1, %v2830_v0  ;;  %202 = vst.msk [vmem:[#allocation2 + $0xe8] sm:$0x3] %vm174_vm1, %v2830_v0  ;;  %v243_v20 = vld [vmem:[%s2939_s18 + $0x80] sm:$0xff]  ;;  %v244_v21 = vld [vmem:[%s2939_s18 + $0x88] sm:$0xff] }
  0x1c   : > { %200 = vst.msk [vmem:[#allocation2 + $0xd8] sm:$0xff] %vm171_vm0, %v2830_v0  ;;  %201 = vst.msk [vmem:[#allocation2 + $0xe0] sm:$0xff] %vm171_vm0, %v2830_v0  ;;  %v245_v22 = vld [vmem:[%s2939_s18 + $0x90] sm:$0xff]  ;;  %v246_v23 = vld [vmem:[%s2939_s18 + $0x98] sm:$0xff] }
  0x1d   : > { %203 = vst.msk [vmem:[#allocation2 + $0xf0] sm:$0xff] %vm171_vm0, %v2830_v0  ;;  %204 = vst.msk [vmem:[#allocation2 + $0xf8] sm:$0xff] %vm171_vm0, %v2830_v0  ;;  %v247_v24 = vld [vmem:[%s2939_s18 + $0xa0] sm:$0xff]  ;;  %v248_v25 = vld [vmem:[%s2939_s18 + $0xa8] sm:$0xff] }
  0x1e   : > { %205 = vst.msk [vmem:[#allocation2 + $0x100] sm:$0x3] %vm174_vm1, %v2830_v0  ;;  %208 = vst.msk [vmem:[#allocation2 + $0x118] sm:$0x3] %vm174_vm1, %v2830_v0  ;;  %v249_v35 = vld [vmem:[%s2939_s18 + $0xb0] sm:$0xff]  ;;  %v250_v36 = vld [vmem:[%s2939_s18 + $0xb8] sm:$0xff] }
  0x1f   : > { %206 = vst.msk [vmem:[#allocation2 + $0x108] sm:$0xff] %vm171_vm0, %v2830_v0  ;;  %207 = vst.msk [vmem:[#allocation2 + $0x110] sm:$0xff] %vm171_vm0, %v2830_v0  ;;  %v251_v52 = vld [vmem:[%s2939_s18 + $0xc0] sm:$0xff]  ;;  %v252_v53 = vld [vmem:[%s2939_s18 + $0xc8] sm:$0xff] }
  0x20   : > { %209 = vst.msk [vmem:[#allocation2 + $0x120] sm:$0xff] %vm171_vm0, %v2830_v0  ;;  %210 = vst.msk [vmem:[#allocation2 + $0x128] sm:$0xff] %vm171_vm0, %v2830_v0  ;;  %v253_v54 = vld [vmem:[%s2939_s18 + $0xd0] sm:$0xff]  ;;  %v254_v56 = vld [vmem:[%s2939_s18 + $0xd8] sm:$0xff] }
  0x21   : > { %211 = vst.msk [vmem:[#allocation2 + $0x130] sm:$0x3] %vm174_vm1, %v2830_v0  ;;  %214 = vst.msk [vmem:[#allocation2 + $0x148] sm:$0x3] %vm174_vm1, %v2830_v0  ;;  %v255_v57 = vld [vmem:[%s2939_s18 + $0xe0] sm:$0xff]  ;;  %v256_v58 = vld [vmem:[%s2939_s18 + $0xe8] sm:$0xff] }
  0x22   : > { %212 = vst.msk [vmem:[#allocation2 + $0x138] sm:$0xff] %vm171_vm0, %v2830_v0  ;;  %213 = vst.msk [vmem:[#allocation2 + $0x140] sm:$0xff] %vm171_vm0, %v2830_v0 }
  0x23   : > { %215 = vst.msk [vmem:[#allocation2 + $0x150] sm:$0xff] %vm171_vm0, %v2830_v0  ;;  %216 = vst.msk [vmem:[#allocation2 + $0x158] sm:$0xff] %vm171_vm0, %v2830_v0 }
  0x24   : > { %217 = vst.msk [vmem:[#allocation2 + $0x160] sm:$0x3] %vm174_vm1, %v2830_v0  ;;  %220 = vst.msk [vmem:[#allocation2 + $0x178] sm:$0x3] %vm174_vm1, %v2830_v0 }
  0x25   : > { %218 = vst.msk [vmem:[#allocation2 + $0x168] sm:$0xff] %vm171_vm0, %v2830_v0  ;;  %219 = vst.msk [vmem:[#allocation2 + $0x170] sm:$0xff] %vm171_vm0, %v2830_v0 }
  0x26   : > { %221 = vst.msk [vmem:[#allocation2 + $0x180] sm:$0xff] %vm171_vm0, %v2830_v0  ;;  %222 = vst.msk [vmem:[#allocation2 + $0x188] sm:$0xff] %vm171_vm0, %v2830_v0 }
  0x27   : > { %223 = vst.msk [vmem:[#allocation2 + $0x190] sm:$0x3] %vm174_vm1, %v2830_v0  ;;  %226 = vst.msk [vmem:[#allocation2 + $0x1a8] sm:$0x3] %vm174_vm1, %v2830_v0 }
  0x28   : > { %224 = vst.msk [vmem:[#allocation2 + $0x198] sm:$0xff] %vm171_vm0, %v2830_v0  ;;  %225 = vst.msk [vmem:[#allocation2 + $0x1a0] sm:$0xff] %vm171_vm0, %v2830_v0 }
  0x29   : > { %262 = vst.msk [vmem:[#allocation2 + $0x31] sm:$0xff] %vm171_vm0, %v229_v1  ;;  %263 = vst.msk [vmem:[#allocation2 + $0x39] sm:$0xff] %vm171_vm0, %v230_v2 }
  0x2a   : > { %260 = vst.msk [vmem:[#allocation2 + $0x19] sm:$0xff] %vm171_vm0, %v227_v3  ;;  %261 = vst.msk [vmem:[#allocation2 + $0x21] sm:$0xff] %vm171_vm0, %v228_v4 }
  0x2b   : > { %264 = vst.msk [vmem:[#allocation2 + $0x49] sm:$0xff] %vm171_vm0, %v231_v5  ;;  %265 = vst.msk [vmem:[#allocation2 + $0x51] sm:$0xff] %vm171_vm0, %v232_v6 }
  0x2c   : > { %266 = vst.msk [vmem:[#allocation2 + $0x61] sm:$0xff] %vm171_vm0, %v233_v9  ;;  %267 = vst.msk [vmem:[#allocation2 + $0x69] sm:$0xff] %vm171_vm0, %v234_v11 }
  0x2d   : > { %268 = vst.msk [vmem:[#allocation2 + $0x79] sm:$0xff] %vm171_vm0, %v235_v12  ;;  %269 = vst.msk [vmem:[#allocation2 + $0x81] sm:$0xff] %vm171_vm0, %v236_v13 }
  0x2e   : > { %270 = vst.msk [vmem:[#allocation2 + $0x91] sm:$0xff] %vm171_vm0, %v237_v14  ;;  %271 = vst.msk [vmem:[#allocation2 + $0x99] sm:$0xff] %vm171_vm0, %v238_v15 }
  0x2f   : > { %272 = vst.msk [vmem:[#allocation2 + $0xa9] sm:$0xff] %vm171_vm0, %v239_v16  ;;  %273 = vst.msk [vmem:[#allocation2 + $0xb1] sm:$0xff] %vm171_vm0, %v240_v17 }
  0x30   : > { %274 = vst.msk [vmem:[#allocation2 + $0xc1] sm:$0xff] %vm171_vm0, %v241_v18  ;;  %275 = vst.msk [vmem:[#allocation2 + $0xc9] sm:$0xff] %vm171_vm0, %v242_v19  ;;  %v2983_v26 = vld [vmem:[#allocation2 + $0x31] sm:$0xff]  ;;  %v2985_v27 = vld [vmem:[#allocation2 + $0x39] sm:$0xff]  ;;  %v2832_v18 = vmov 0.0|0.0  }
  0x31   : > { %276 = vst.msk [vmem:[#allocation2 + $0xd9] sm:$0xff] %vm171_vm0, %v243_v20  ;;  %277 = vst.msk [vmem:[#allocation2 + $0xe1] sm:$0xff] %vm171_vm0, %v244_v21  ;;  %v2987_v28 = vld [vmem:[#allocation2 + $0x19] sm:$0xff]  ;;  %v2258_v29 = vpack.i.bf16 %v2985_v27, %v2983_v26  ;;  %v2994_v30 = vld [vmem:[#allocation2 + $0x21] sm:$0xff]  ;;  %2186 = vmatprep.subr.bf16.mxu0 %v2832_v18  ;;  %2213 = vmatprep.subr.bf16.mxu1 %v2832_v18 }
  0x32   : > { %278 = vst.msk [vmem:[#allocation2 + $0xf1] sm:$0xff] %vm171_vm0, %v245_v22  ;;  %279 = vst.msk [vmem:[#allocation2 + $0xf9] sm:$0xff] %vm171_vm0, %v246_v23  ;;  %v330_v31 = vld [vmem:[#allocation2 + $0x49] sm:$0xff]  ;;  %v331_v32 = vld [vmem:[#allocation2 + $0x51] sm:$0xff]  ;;  %v2253_v33 = vpack.i.bf16 %v2994_v30, %v2987_v28 }
  0x33   : > { %280 = vst.msk [vmem:[#allocation2 + $0x109] sm:$0xff] %vm171_vm0, %v247_v24  ;;  %281 = vst.msk [vmem:[#allocation2 + $0x111] sm:$0xff] %vm171_vm0, %v248_v25  ;;  %v332_v34 = vld [vmem:[#allocation2 + $0x61] sm:$0xff]  ;;  %2259 = vrot.lane.b32.xlu1 %v2258_v29, %s2831_s19  ;;  %v2263_v37 = vpack.i.bf16 %v331_v32, %v330_v31  ;;  %v333_v38 = vld [vmem:[#allocation2 + $0x69] sm:$0xff] }
  0x34   : > { %282 = vst.msk [vmem:[#allocation2 + $0x121] sm:$0xff] %vm171_vm0, %v249_v35  ;;  %283 = vst.msk [vmem:[#allocation2 + $0x129] sm:$0xff] %vm171_vm0, %v250_v36  ;;  %2254 = vrot.lane.b32.xlu0 %v2253_v33, %s2831_s19  ;;  %v2268_v39 = vpack.i.bf16 %v333_v38, %v332_v34  ;;  %v334_v40 = vld [vmem:[#allocation2 + $0x79] sm:$0xff]  ;;  %v335_v41 = vld [vmem:[#allocation2 + $0x81] sm:$0xff] }
  0x35   : > { %v3004_v42 = vld [vmem:[#allocation2 + $0x91] sm:$0xff]  ;;  %v3006_v43 = vld [vmem:[#allocation2 + $0x99] sm:$0xff]  ;;  %v2273_v46 = vpack.i.bf16 %v335_v41, %v334_v40  ;;  %284 = vst.msk [vmem:[#allocation2 + $0x139] sm:$0xff] %vm171_vm0, %v251_v52  ;;  %285 = vst.msk [vmem:[#allocation2 + $0x141] sm:$0xff] %vm171_vm0, %v252_v53 }
  0x36   : > { %v338_v44 = vld [vmem:[#allocation2 + $0xa9] sm:$0xff]  ;;  %v339_v45 = vld [vmem:[#allocation2 + $0xb1] sm:$0xff]  ;;  %v2278_v51 = vpack.i.bf16 %v3006_v43, %v3004_v42  ;;  %286 = vst.msk [vmem:[#allocation2 + $0x151] sm:$0xff] %vm171_vm0, %v253_v54  ;;  %287 = vst.msk [vmem:[#allocation2 + $0x159] sm:$0xff] %vm171_vm0, %v254_v56 }
  0x37   : > { %2264 = vrot.lane.b32.xlu1 %v2263_v37, %s2831_s19  ;;  %v340_v47 = vld [vmem:[#allocation2 + $0xc1] sm:$0xff]  ;;  %v341_v48 = vld [vmem:[#allocation2 + $0xc9] sm:$0xff]  ;;  %288 = vst.msk [vmem:[#allocation2 + $0x169] sm:$0xff] %vm171_vm0, %v255_v57  ;;  %289 = vst.msk [vmem:[#allocation2 + $0x171] sm:$0xff] %vm171_vm0, %v256_v58  ;;  %v2283_v62 = vpack.i.bf16 %v339_v45, %v338_v44 }
  0x38   : > { %2269 = vrot.lane.b32.xlu0 %v2268_v39, %s2831_s19  ;;  %v2288_v1 = vpack.i.bf16 %v341_v48, %v340_v47  ;;  %v3034_v2 = vld [vmem:[#allocation2 + $0xd9] sm:$0xff]  ;;  %v3036_v3 = vld [vmem:[#allocation2 + $0xe1] sm:$0xff]  ;;  %v357_v23 = vld [vmem:[#allocation2 + $0xa] sm:$0xff] }
  0x39   : > { %v3038_v4 = vld [vmem:[#allocation2 + $0xf1] sm:$0xff]  ;;  %v3040_v5 = vld [vmem:[#allocation2 + $0xf9] sm:$0xff]  ;;  %v2293_v6 = vpack.i.bf16 %v3036_v3, %v3034_v2  ;;  %v356_v22 = vld [vmem:[#allocation2 + $0x2] sm:$0xff] }
  0x3a   : > { %v346_v49 = vld [vmem:[#allocation2 + $0x109] sm:$0xff]  ;;  %v347_v50 = vld [vmem:[#allocation2 + $0x111] sm:$0xff]  ;;  %v2298_v7 = vpack.i.bf16 %v3040_v5, %v3038_v4  ;;  %v2328_v25 = vpack.i.bf16 %v357_v23, %v356_v22  ;;  %v3071_v29 = vld [vmem:[#allocation2 + $0x1a] sm:$0xff] }
  0x3b   : > { %v3015_v55 = vpack.i.bf16 %v346_v49, %v330_v31  ;;  %v3023_v59 = vpack.i.bf16 %v347_v50, %v331_v32  ;;  %v348_v60 = vld [vmem:[#allocation2 + $0x121] sm:$0xff]  ;;  %v349_v61 = vld [vmem:[#allocation2 + $0x129] sm:$0xff]  ;;  %2274 = vrot.lane.b32.xlu1 %v2273_v46, %s2831_s19  ;;  %v2303_v14 = vpack.i.bf16 %v347_v50, %v346_v49  ;;  %v3075_v32 = vld [vmem:[#allocation2 + $0x32] sm:$0xff] }
  0x3c   : > { %v3029_v63 = vpack.i.bf16 %v348_v60, %v332_v34  ;;  %v3031_v0 = vpack.i.bf16 %v349_v61, %v333_v38  ;;  %2279 = vrot.lane.b32.xlu0 %v2278_v51, %s2831_s19  ;;  %v350_v8 = vld [vmem:[#allocation2 + $0x139] sm:$0xff]  ;;  %v351_v9 = vld [vmem:[#allocation2 + $0x141] sm:$0xff]  ;;  %v2308_v15 = vpack.i.bf16 %v349_v61, %v348_v60  ;;  %v3084_v36 = vld [vmem:[#allocation2 + $0x4a] sm:$0xff] }
  0x3d   : > { %v3048_v10 = vld [vmem:[#allocation2 + $0x151] sm:$0xff]  ;;  %v3050_v11 = vpack.i.bf16 %v350_v8, %v334_v40  ;;  %v3052_v12 = vpack.i.bf16 %v351_v9, %v335_v41  ;;  %v3058_v16 = vld [vmem:[#allocation2 + $0x159] sm:$0xff]  ;;  %v2313_v17 = vpack.i.bf16 %v351_v9, %v350_v8  ;;  %v3073_v31 = vld [vmem:[#allocation2 + $0x22] sm:$0xff] }
  0x3e   : > { %v2618_v13 = vpack.i.bf16 %v3048_v10, %v3004_v42  ;;  %v2318_v19 = vpack.i.bf16 %v3058_v16, %v3048_v10  ;;  %v3065_v20 = vld [vmem:[#allocation2 + $0x169] sm:$0xff]  ;;  %v355_v21 = vld [vmem:[#allocation2 + $0x171] sm:$0xff]  ;;  %v3077_v33 = vld [vmem:[#allocation2 + $0x3a] sm:$0xff]  ;;  %v2648_v34 = vpack.i.bf16 %v3058_v16, %v3006_v43  ;;  %v2333_v35 = vpack.i.bf16 %v3073_v31, %v3071_v29 }
  0x3f   : > { %2284 = vrot.lane.b32.xlu1 %v2283_v62, %s2831_s19  ;;  %v2323_v24 = vpack.i.bf16 %v355_v21, %v3065_v20  ;;  %v3086_v37 = vld [vmem:[#allocation2 + $0x52] sm:$0xff]  ;;  %v2338_v38 = vpack.i.bf16 %v3077_v33, %v3075_v32  ;;  %v3091_v39 = vld [vmem:[#allocation2 + $0x62] sm:$0xff]  ;;  %v3099_v44 = vld [vmem:[#allocation2 + $0x6a] sm:$0xff] }
  0x40   : > { %2289 = vrot.lane.b32.xlu0 %v2288_v1, %s2831_s19  ;;  %v1707_v40 = vld [vmem:[%s3945_s1] sm:$0xff]  ;;  %v1708_v41 = vld [vmem:[%s3945_s1 + $0x8] sm:$0xff]  ;;  %v1709_v46 = vld [vmem:[%s3945_s1 + $0x10] sm:$0xff]  ;;  %v2343_v48 = vpack.i.bf16 %v3086_v37, %v3084_v36  ;;  %v2348_v51 = vpack.i.bf16 %v3099_v44, %v3091_v39 }
  0x41   : > { %v2187_v45 = vpack.c.bf16 %v1708_v41, %v1707_v40  ;;  %v1710_v47 = vld [vmem:[%s3945_s1 + $0x18] sm:$0xff]  ;;  %v3115_v52 = vld [vmem:[#allocation2 + $0x82] sm:$0xff]  ;;  %v370_v60 = vld [vmem:[#allocation2 + $0xaa] sm:$0xff] }
  0x42   : > { %v3110_v49 = vld [vmem:[#allocation2 + $0x7a] sm:$0xff]  ;;  %v2190_v50 = vpack.c.bf16 %v1710_v47, %v1709_v46  ;;  %v1712_v54 = vld [vmem:[%s3945_s1 + $0x28] sm:$0xff]  ;;  %v3123_v56 = vld [vmem:[#allocation2 + $0x92] sm:$0xff] }
  0x43   : > { %2294 = vrot.lane.b32.xlu1 %v2293_v6, %s2831_s19  ;;  %2188 = vmatpush1.bf16.msra.mxu0 %v2187_v45  ;;  %v1711_v53 = vld [vmem:[%s3945_s1 + $0x20] sm:$0xff]  ;;  %v2353_v58 = vpack.i.bf16 %v3115_v52, %v3110_v49  ;;  %v371_v1 = vld [vmem:[#allocation2 + $0xb2] sm:$0xff]  ;;  %v373_v9 = vld [vmem:[#allocation2 + $0xca] sm:$0xff] }
  0x44   : > { %2299 = vrot.lane.b32.xlu0 %v2298_v7, %s2831_s19  ;;  %2222 = vmatpush1.bf16.msra.mxu1 %v2187_v45  ;;  %v3125_v57 = vld [vmem:[#allocation2 + $0x9a] sm:$0xff]  ;;  %v2193_v61 = vpack.c.bf16 %v1712_v54, %v1711_v53  ;;  %v1713_v6 = vld [vmem:[%s3945_s1 + $0x30] sm:$0xff]  ;;  %v372_v8 = vld [vmem:[#allocation2 + $0xc2] sm:$0xff] }
  0x45   : > { %2189 = vmatprep.subr.bf16.mxu0 %v2832_v18  ;;  %2214 = vmatprep.subr.bf16.mxu1 %v2832_v18  ;;  %v2358_v62 = vpack.i.bf16 %v3125_v57, %v3123_v56  ;;  %v1714_v7 = vld [vmem:[%s3945_s1 + $0x38] sm:$0xff]  ;;  %v3147_v21 = vld [vmem:[#allocation2 + $0xe2] sm:$0xff]  ;;  %v1717_v46 = vld [vmem:[%s3945_s1 + $0x50] sm:$0xff] }
  0x46   : > { %v1715_v22 = vld [vmem:[%s3945_s1 + $0x40] sm:$0xff]  ;;  %v1716_v23 = vld [vmem:[%s3945_s1 + $0x48] sm:$0xff]  ;;  %v3169_v45 = vld [vmem:[#allocation2 + $0x112] sm:$0xff] }
  0x47   : > { %2304 = vrot.lane.b32.xlu1 %v2303_v14, %s2831_s19  ;;  %2191 = vmatpush1.bf16.msra.mxu0 %v2190_v50  ;;  %v2363_v14 = vpack.i.bf16 %v371_v1, %v370_v60  ;;  %v2199_v40 = vpack.c.bf16 %v1716_v23, %v1715_v22  ;;  %v1718_v47 = vld [vmem:[%s3945_s1 + $0x58] sm:$0xff]  ;;  %v1719_v60 = vld [vmem:[%s3945_s1 + $0x60] sm:$0xff]  ;;  %v3202_v1 = vld [vmem:[#allocation2 + $0x30] sm:$0xff] }
  0x48   : > { %2309 = vrot.lane.b32.xlu0 %v2308_v15, %s2831_s19  ;;  %2223 = vmatpush1.bf16.msra.mxu1 %v2190_v50  ;;  %v3144_v15 = vld [vmem:[#allocation2 + $0xda] sm:$0xff]  ;;  %v2202_v54 = vpack.c.bf16 %v1718_v47, %v1717_v46  ;;  %v2418_v47 = vpack.i.bf16 %v3036_v3, %v2994_v30  ;;  %v2438_v3 = vpack.i.bf16 %v3040_v5, %v2985_v27  ;;  %v3275_v27 = vld [vmem:[#allocation2 + $0x50] sm:$0xff] }
  0x49   : > { %2192 = vmatprep.subr.bf16.mxu0 %v2832_v18  ;;  %2215 = vmatprep.subr.bf16.mxu1 %v2832_v18  ;;  %v3179_v50 = vld [vmem:[#allocation2 + $0xd8] sm:$0xff]  ;;  %v1723_v23 = vld [vmem:[%s3945_s1 + $0x80] sm:$0xff]  ;;  %v3277_v5 = vld [vmem:[#allocation2 + $0x110] sm:$0xff] }
  0x4a   : > { %v431_v43 = vld [vmem:[#allocation2 + $0x99] sm:$0xff] }
  0x4b   : > { %2314 = vrot.lane.b32.xlu1 %v2313_v17, %s2831_s19  ;;  %2194 = vmatpush1.bf16.msra.mxu0 %v2193_v61  ;;  %v2196_v17 = vpack.c.bf16 %v1714_v7, %v1713_v6  ;;  %v3204_v6 = vld [vmem:[#allocation2 + $0xf0] sm:$0xff]  ;;  %v447_v16 = vld [vmem:[#allocation2 + $0x159] sm:$0xff] }
  0x4c   : > { %2319 = vrot.lane.b32.xlu0 %v2318_v19, %s2831_s19  ;;  %v2368_v19 = vpack.i.bf16 %v373_v9, %v372_v8  ;;  %2224 = vmatpush1.bf16.msra.mxu1 %v2193_v61  ;;  %v1720_v61 = vld [vmem:[%s3945_s1 + $0x68] sm:$0xff]  ;;  %v1721_v8 = vld [vmem:[%s3945_s1 + $0x70] sm:$0xff]  ;;  %v2398_v9 = vpack.i.bf16 %v3144_v15, %v3071_v29  ;;  %v2403_v29 = vpack.i.bf16 %v3204_v6, %v3202_v1 }
  0x4d   : > { %2195 = vmatprep.subr.bf16.mxu0 %v2832_v18  ;;  %2216 = vmatprep.subr.bf16.mxu1 %v2832_v18  ;;  %v2205_v7 = vpack.c.bf16 %v1720_v61, %v1719_v60  ;;  %v490_v60 = vld [vmem:[#allocation2 + $0x68] sm:$0xff] }
  0x4e   : > { %v506_v61 = vld [vmem:[#allocation2 + $0x128] sm:$0xff] }
  0x4f   : > { %2324 = vrot.lane.b32.xlu1 %v2323_v24, %s2831_s19  ;;  %v3155_v24 = vld [vmem:[#allocation2 + $0xf2] sm:$0xff]  ;;  %2197 = vmatpush1.bf16.msra.mxu0 %v2196_v17  ;;  %s3875_s19 = scalar_lea.vmem %s3947_s3, %s2184_s15 }
  0x50   : > { %2329 = vrot.lane.b32.xlu0 %v2328_v25, %s2833_s20  ;;  %v3157_v25 = vld [vmem:[#allocation2 + $0xfa] sm:$0xff]  ;;  %2225 = vmatpush1.bf16.msra.mxu1 %v2196_v17 }
  0x51   : > { %v2378_v41 = vpack.i.bf16 %v3157_v25, %v3155_v24  ;;  %2198 = vmatprep.subr.bf16.mxu0 %v2832_v18  ;;  %2217 = vmatprep.subr.bf16.mxu1 %v2832_v18  ;;  %v3215_v17 = vld [vmem:[#allocation2 + $0x20] sm:$0xff] }
  0x53   : > { %2334 = vrot.lane.b32.xlu1 %v2333_v35, %s2833_s20  ;;  %v2373_v35 = vpack.i.bf16 %v3147_v21, %v3144_v15  ;;  %2200 = vmatpush1.bf16.msra.mxu0 %v2199_v40 }
  0x54   : > { %2339 = vrot.lane.b32.xlu0 %v2338_v38, %s2833_s20  ;;  %v3164_v38 = vld [vmem:[#allocation2 + $0x10a] sm:$0xff]  ;;  %2226 = vmatpush1.bf16.msra.mxu1 %v2199_v40  ;;  %v258_v40 = vld [vmem:[%s2939_s18 + $0xf8] sm:$0xff] }
  0x55   : > { %v2383_v53 = vpack.i.bf16 %v3169_v45, %v3164_v38  ;;  %2201 = vmatprep.subr.bf16.mxu0 %v2832_v18  ;;  %2218 = vmatprep.subr.bf16.mxu1 %v2832_v18  ;;  %291 = vst.msk [vmem:[#allocation2 + $0x189] sm:$0xff] %vm171_vm0, %v258_v40 }
  0x57   : > { %2344 = vrot.lane.b32.xlu1 %v2343_v48, %s2833_s20  ;;  %v3177_v48 = vld [vmem:[#allocation2 + $0x18] sm:$0xff]  ;;  %2203 = vmatpush1.bf16.msra.mxu0 %v2202_v54 }
  0x58   : > { %2349 = vrot.lane.b32.xlu0 %v2348_v51, %s2833_s20  ;;  %v257_v51 = vld [vmem:[%s2939_s18 + $0xf0] sm:$0xff]  ;;  %2227 = vmatpush1.bf16.msra.mxu1 %v2202_v54  ;;  %s2838_s18 = smov 112   ;;  %v2498_v54 = vpack.i.bf16 %v3164_v38, %v3084_v36  ;;  %v2523_v36 = vpack.i.bf16 %v3169_v45, %v3086_v37  ;;  %v507_v37 = vld [vmem:[#allocation2 + $0x138] sm:$0xff] }
  0x59   : > { %290 = vst.msk [vmem:[#allocation2 + $0x181] sm:$0xff] %vm171_vm0, %v257_v51  ;;  %2204 = vmatprep.subr.bf16.mxu0 %v2832_v18  ;;  %2219 = vmatprep.subr.bf16.mxu1 %v2832_v18  ;;  %v3245_v51 = vld [vmem:[#allocation2 + $0x38] sm:$0xff] }
  0x5b   : > { %2354 = vrot.lane.b32.xlu1 %v2353_v58, %s2833_s20  ;;  %v2388_v58 = vpack.i.bf16 %v3179_v50, %v3177_v48  ;;  %2206 = vmatpush1.bf16.msra.mxu0 %v2205_v7 }
  0x5c   : > { %2359 = vrot.lane.b32.xlu0 %v2358_v62, %s2833_s20  ;;  %v2393_v62 = vpack.i.bf16 %v3034_v2, %v2987_v28  ;;  %v1722_v28 = vld [vmem:[%s3945_s1 + $0x78] sm:$0xff]  ;;  %2228 = vmatpush1.bf16.msra.mxu1 %v2205_v7 }
  0x5d   : > { %v549_v2 = vld [vmem:[#allocation2 + $0x32] sm:$0xff]  ;;  %v2208_v15 = vpack.c.bf16 %v1722_v28, %v1721_v8  ;;  %2207 = vmatprep.subr.bf16.mxu0 %v2832_v18  ;;  %2220 = vmatprep.subr.bf16.mxu1 %v2832_v18 }
  0x5e   : > { %2150 = vmatprep.mubr.msk.f32.mxu0 %vm171_vm0, %v549_v2  ;;  %v491_v8 = vld [vmem:[#allocation2 + $0x78] sm:$0xff] }
  0x5f   : > { %2364 = vrot.lane.b32.xlu1 %v2363_v14, %s2833_s20  ;;  %v565_v14 = vld [vmem:[#allocation2 + $0xf2] sm:$0xff]  ;;  %2209 = vmatpush1.bf16.msra.mxu0 %v2208_v15 }
  0x60   : > { %2369 = vrot.lane.b32.xlu0 %v2368_v19, %s2833_s20  ;;  %v3217_v19 = vld [vmem:[#allocation2 + $0xe0] sm:$0xff]  ;;  %2166 = vmatprep.mubr.msk.f32.mxu1 %vm171_vm0, %v565_v14 }
  0x61   : > { %v2408_v22 = vpack.i.bf16 %v3217_v19, %v3215_v17  ;;  %2229 = vmatpush1.bf16.msra.mxu1 %v2208_v15  ;;  %2210 = vmatprep.subr.bf16.mxu0 %v2832_v18 }
  0x62   : > { %2221 = vmatprep.subr.bf16.mxu1 %v2832_v18  ;;  %v3265_v18 = vld [vmem:[#allocation2 + $0x48] sm:$0xff] }
  0x63   : > { %2374 = vrot.lane.b32.xlu1 %v2373_v35, %s2833_s20  ;;  %v1724_v35 = vld [vmem:[%s3945_s1 + $0x88] sm:$0xff] }
  0x64   : > { %2379 = vrot.lane.b32.xlu0 %v2378_v41, %s2833_s20  ;;  %v2413_v41 = vpack.i.bf16 %v3038_v4, %v2983_v26  ;;  %v2211_v46 = vpack.c.bf16 %v1724_v35, %v1723_v23  ;;  %v2423_v26 = vpack.i.bf16 %v3147_v21, %v3073_v31  ;;  %v2448_v4 = vpack.i.bf16 %v3155_v24, %v3075_v32  ;;  %v3267_v31 = vld [vmem:[#allocation2 + $0x108] sm:$0xff]  ;;  %v303_v35 = vld [vmem:[#allocation2 + $0x80] sm:$0xff] }
  0x65   : > { %v2453_v21 = vpack.i.bf16 %v3267_v31, %v3265_v18  ;;  %v2473_v32 = vpack.i.bf16 %v3157_v25, %v3077_v33  ;;  %v2478_v24 = vpack.i.bf16 %v3277_v5, %v3275_v27  ;;  %v3295_v33 = vld [vmem:[#allocation2 + $0x120] sm:$0xff] }
  0x66   : > { %2212 = vmatpush1.bf16.msra.mxu0 %v2211_v46  ;;  %2230 = vmatpush1.bf16.msra.mxu1 %v2211_v46 }
  0x67   : > { %2384 = vrot.lane.b32.xlu1 %v2383_v53, %s2833_s20  ;;  %v3247_v53 = vld [vmem:[#allocation2 + $0xf8] sm:$0xff] }
  0x68   : > { %2389 = vrot.lane.b32.xlu0 %v2388_v58, %s2834_s29  ;;  %v2428_v30 = vpack.i.bf16 %v3247_v53, %v3245_v51  ;;  %v3293_v58 = vld [vmem:[#allocation2 + $0x60] sm:$0xff] }
  0x69   : > { %v2503_v25 = vpack.i.bf16 %v3295_v33, %v3293_v58 }
  0x6b   : > { %2394 = vrot.lane.b32.xlu1 %v2393_v62, %s2835_s5  ;;  %v474_v62 = vld [vmem:[#allocation2 + $0x122] sm:$0xff] }
  0x6c   : > { %2399 = vrot.lane.b32.xlu0 %v2398_v9, %s2836_s6  ;;  %v2548_v7 = vpack.i.bf16 %v474_v62, %v3091_v39  ;;  %v2553_v9 = vpack.i.bf16 %v507_v37, %v491_v8  ;;  %v475_v39 = vld [vmem:[#allocation2 + $0x12a] sm:$0xff]  ;;  %v3396_v37 = vld [vmem:[#allocation2 + $0x152] sm:$0xff] }
  0x6d   : > { %v2578_v15 = vpack.i.bf16 %v475_v39, %v474_v62 }
  0x6f   : > { %2404 = vrot.lane.b32.xlu1 %v2403_v29, %s2837_s11 }
  0x70   : > { %2409 = vrot.lane.b32.xlu0 %v2408_v22, %s2834_s29  ;;  %v508_v22 = vld [vmem:[#allocation2 + $0x140] sm:$0xff] }
  0x73   : > { %2414 = vrot.lane.b32.xlu1 %v2413_v41, %s2838_s18 }
  0x74   : > { %2419 = vrot.lane.b32.xlu0 %v2418_v47, %s2835_s5 }
  0x77   : > { %2424 = vrot.lane.b32.xlu1 %v2423_v26, %s2836_s6  ;;  %v320_v26 = vld [vmem:[#allocation2 + $0x150] sm:$0xff] }
  0x78   : > { %2429 = vrot.lane.b32.xlu0 %v2428_v30, %s2837_s11 }
  0x7b   : > { %2434 = vrot.lane.b32.xlu1 %v2403_v29, %s2834_s29 }
  0x7c   : > { %2439 = vrot.lane.b32.xlu0 %v2438_v3, %s2838_s18 }
  0x7f   : > { %2444 = vrot.lane.b32.xlu1 %v2413_v41, %s2835_s5  ;;  %v2583_v41 = vpack.i.bf16 %v508_v22, %v303_v35  ;;  %v322_v22 = vld [vmem:[#allocation2 + $0x168] sm:$0xff] }
  0x80   : > { %2449 = vrot.lane.b32.xlu0 %v2448_v4, %s2836_s6 }
  0x83   : > { %2454 = vrot.lane.b32.xlu1 %v2453_v21, %s2837_s11 }
  0x84   : > { %2459 = vrot.lane.b32.xlu0 %v2428_v30, %s2834_s29 }
  0x87   : > { %2464 = vrot.lane.b32.xlu1 %v3015_v55, %s2838_s18 }
  0x88   : > { %2469 = vrot.lane.b32.xlu0 %v2438_v3, %s2835_s5  ;;  %v304_v3 = vld [vmem:[#allocation2 + $0x90] sm:$0xff] }
  0x8b   : > { %2474 = vrot.lane.b32.xlu1 %v2473_v32, %s2836_s6  ;;  %v3312_v38 = vpop.permute.xlu0 %2249 }
  0x8c   : > { %2479 = vrot.lane.b32.xlu0 %v2478_v24, %s2837_s11 }
  0x8f   : > { %2484 = vrot.lane.b32.xlu1 %v2453_v21, %s2834_s29  ;;  %v2608_v21 = vpack.i.bf16 %v320_v26, %v304_v3  ;;  %v2678_v26 = vpack.i.bf16 %v447_v16, %v431_v43  ;;  %v3424_v3 = vld [vmem:[#allocation2 + $0x15a] sm:$0xff] }
  0x90   : > { %2489 = vrot.lane.b32.xlu0 %v3023_v59, %s2838_s18  ;;  %3969 = vst [vmem:[#allocation12_spill] sm:$0xff] %v3424_v3 }
  0x93   : > { %2494 = vrot.lane.b32.xlu1 %v3015_v55, %s2835_s5  ;;  %v2528_v55 = vpack.i.bf16 %v506_v61, %v490_v60 }
  0x94   : > { %2499 = vrot.lane.b32.xlu0 %v2498_v54, %s2836_s6 }
  0x97   : > { %2504 = vrot.lane.b32.xlu1 %v2503_v25, %s2837_s11 }
  0x98   : > { %2509 = vrot.lane.b32.xlu0 %v2478_v24, %s2834_s29 }
  0x9b   : > { %2514 = vrot.lane.b32.xlu1 %v3029_v63, %s2838_s18 }
  0x9c   : > { %2519 = vrot.lane.b32.xlu0 %v3023_v59, %s2835_s5 }
  0x9f   : > { %2524 = vrot.lane.b32.xlu1 %v2523_v36, %s2836_s6  ;;  %v305_v36 = vld [vmem:[#allocation2 + $0x98] sm:$0xff] }
  0xa0   : > { %2529 = vrot.lane.b32.xlu0 %v2528_v55, %s2837_s11 }
  0xa3   : > { %2534 = vrot.lane.b32.xlu1 %v2503_v25, %s2834_s29  ;;  %v3369_v25 = vld [vmem:[#allocation2 + $0x142] sm:$0xff] }
  0xa4   : > { %2539 = vrot.lane.b32.xlu0 %v3031_v0, %s2838_s18 }
  0xa5   : > { %v3318_v45 = vpop.permute.xlu1 %2259 }
  0xa6   : > { %v3320_v59 = vpop.permute.xlu0 %2254 }
  0xa7   : > { %2544 = vrot.lane.b32.xlu1 %v3029_v63, %s2835_s5  ;;  %v2573_v63 = vpack.i.bf16 %v475_v39, %v3099_v44  ;;  %v2658_v39 = vpack.i.bf16 %v3396_v37, %v3123_v56 }
  0xa8   : > { %2549 = vrot.lane.b32.xlu0 %v2548_v7, %s2836_s6 }
  0xa9   : > { %v3325_v28 = vpop.permute.xlu1 %2264 }
  0xaa   : > { %v3327_v2 = vpop.permute.xlu0 %2269 }
  0xab   : > { %2554 = vrot.lane.b32.xlu1 %v2553_v9, %s2837_s11 }
  0xac   : > { %2559 = vrot.lane.b32.xlu0 %v2528_v55, %s2834_s29  ;;  %v321_v55 = vld [vmem:[#allocation2 + $0x158] sm:$0xff] }
  0xad   : > { %v3331_v14 = vpop.permute.xlu1 %2274  ;;  %v2638_v7 = vpack.i.bf16 %v321_v55, %v305_v36  ;;  %v2251_v36 = vunpack.i.l.bf16 %v3312_v38 }
  0xae   : > { %3960 = vst [vmem:[#allocation3_spill] sm:$0xff] %v3331_v14  ;;  %v3333_v29 = vpop.permute.xlu0 %2279 }
  0xaf   : > { %3961 = vst [vmem:[#allocation4_spill] sm:$0xff] %v3333_v29  ;;  %2564 = vrot.lane.b32.xlu1 %v3050_v11, %s2838_s18  ;;  %v448_v29 = vld [vmem:[#allocation2 + $0x169] sm:$0xff] }
  0xb0   : > { %2569 = vrot.lane.b32.xlu0 %v3031_v0, %s2835_s5  ;;  %v476_v0 = vld [vmem:[#allocation2 + $0x13a] sm:$0xff] }
  0xb1   : > { %v3340_v23 = vpop.permute.xlu1 %2284  ;;  %v2603_v4 = vpack.i.bf16 %v476_v0, %v3110_v49  ;;  %v2633_v62 = vpack.i.bf16 %v3369_v25, %v476_v0 }
  0xb2   : > { %3962 = vst [vmem:[#allocation5_spill] sm:$0xff] %v3340_v23  ;;  %v3342_v40 = vpop.permute.xlu0 %2289 }
  0xb3   : > { %2574 = vrot.lane.b32.xlu1 %v2573_v63, %s2836_s6  ;;  %v2291_v55 = vunpack.i.l.bf16 %v3342_v40 }
  0xb4   : > { %2579 = vrot.lane.b32.xlu0 %v2578_v15, %s2833_s20  ;;  %v306_v15 = vld [vmem:[#allocation2 + $0xa8] sm:$0xff] }
  0xb5   : > { %v3346_v46 = vpop.permute.xlu1 %2294 }
  0xb6   : > { %v3348_v47 = vpop.permute.xlu0 %2299 }
  0xb7   : > { %2584 = vrot.lane.b32.xlu1 %v2583_v41, %s2837_s11 }
  0xb8   : > { %2589 = vrot.lane.b32.xlu0 %v2553_v9, %s2834_s29 }
  0xb9   : > { %v3352_v44 = vpop.permute.xlu1 %2304 }
  0xba   : > { %v3354_v30 = vpop.permute.xlu0 %2309 }
  0xbb   : > { %2594 = vrot.lane.b32.xlu1 %v3052_v12, %s2838_s18 }
  0xbc   : > { %2599 = vrot.lane.b32.xlu0 %v3050_v11, %s2835_s5  ;;  %v2628_v11 = vpack.i.bf16 %v3369_v25, %v3115_v52 }
  0xbd   : > { %v3361_v32 = vpop.permute.xlu1 %2314 }
  0xbe   : > { %3963 = vst [vmem:[#allocation6_spill] sm:$0xff] %v3361_v32  ;;  %v3363_v24 = vpop.permute.xlu0 %2319 }
  0xbf   : > { %3964 = vst [vmem:[#allocation7_spill] sm:$0xff] %v3363_v24  ;;  %2604 = vrot.lane.b32.xlu1 %v2603_v4, %s2836_s6 }
  0xc0   : > { %2609 = vrot.lane.b32.xlu0 %v2608_v21, %s2837_s11 }
  0xc1   : > { %v3367_v54 = vpop.permute.xlu1 %2324 }
  0xc2   : > { %3965 = vst [vmem:[#allocation8_spill] sm:$0xff] %v3367_v54  ;;  %v3371_v60 = vpop.permute.xlu0 %2329 }
  0xc3   : > { %2614 = vrot.lane.b32.xlu1 %v2583_v41, %s2834_s29  ;;  %v2663_v41 = vpack.i.bf16 %v322_v22, %v306_v15  ;;  %v323_v22 = vld [vmem:[#allocation2 + $0x170] sm:$0xff] }
  0xc4   : > { %2619 = vrot.lane.b32.xlu0 %v2618_v13, %s2838_s18  ;;  %v430_v13 = vld [vmem:[#allocation2 + $0x91] sm:$0xff] }
  0xc5   : > { %v3380_v49 = vpop.permute.xlu1 %2334 }
  0xc6   : > { %v3382_v61 = vpop.permute.xlu0 %2339 }
  0xc7   : > { %2624 = vrot.lane.b32.xlu1 %v3052_v12, %s2835_s5  ;;  %v2653_v12 = vpack.i.bf16 %v3048_v10, %v430_v13  ;;  %v3414_v10 = vld [vmem:[#allocation2 + $0xa9] sm:$0xff]  ;;  %v308_v13 = vld [vmem:[#allocation2 + $0xc0] sm:$0xff] }
  0xc8   : > { %2629 = vrot.lane.b32.xlu0 %v2628_v11, %s2836_s6  ;;  %v2673_v56 = vpack.i.bf16 %v3065_v20, %v3414_v10  ;;  %v2683_v11 = vpack.i.bf16 %v3424_v3, %v3125_v57  ;;  %v2688_v20 = vpack.i.bf16 %v3424_v3, %v3396_v37  ;;  %v1493_v24 = vsel %vm171_vm0, %v308_v13, %v2291_v55 }
  0xc9   : > { %v3388_v8 = vpop.permute.xlu1 %2344 }
  0xca   : > { %v3390_v42 = vpop.permute.xlu0 %2349 }
  0xcb   : > { %2634 = vrot.lane.b32.xlu1 %v2633_v62, %s2833_s20  ;;  %v292_v62 = vld [vmem:[#allocation2] sm:$0xff] }
  0xcc   : > { %2639 = vrot.lane.b32.xlu0 %v2638_v7, %s2837_s11 }
  0xcd   : > { %v3394_v52 = vpop.permute.xlu1 %2354 }
  0xce   : > { %3966 = vst [vmem:[#allocation9_spill] sm:$0xff] %v3394_v52  ;;  %v3398_v9 = vpop.permute.xlu0 %2359 }
  0xcf   : > { %3967 = vst [vmem:[#allocation10_spill] sm:$0xff] %v3398_v9  ;;  %2644 = vrot.lane.b32.xlu1 %v2608_v21, %s2834_s29  ;;  %v1477_v9 = vsel %vm171_vm0, %v292_v62, %v2251_v36  ;;  %v513_v36 = vld [vmem:[#allocation2 + $0x180] sm:$0xff] }
  0xd0   : > { %2649 = vrot.lane.b32.xlu0 %v2648_v34, %s2838_s18 }
  0xd1   : > { %v3408_v63 = vpop.permute.xlu1 %2364 }
  0xd2   : > { %3968 = vst [vmem:[#allocation11_spill] sm:$0xff] %v3408_v63  ;;  %v3410_v35 = vpop.permute.xlu0 %2369  ;;  %v544_v63 = vld [vmem:[#allocation2 + $0x171] sm:$0xff] }
  0xd3   : > { %2654 = vrot.lane.b32.xlu1 %v2653_v12, %s2835_s5  ;;  %v2331_v12 = vunpack.i.l.bf16 %v3371_v60 }
  0xd4   : > { %2659 = vrot.lane.b32.xlu0 %v2658_v39, %s2836_s6  ;;  %v2371_v39 = vunpack.i.l.bf16 %v3410_v35 }
  0xd5   : > { %v3416_v0 = vpop.permute.xlu1 %2374 }
  0xd6   : > { %v3418_v34 = vpop.permute.xlu0 %2379  ;;  %v1526_v52 = vsel %vm1509_vm2, %v1493_v24, %v2371_v39  ;;  %v2708_v39 = vpack.i.bf16 %v448_v29, %v3414_v10 }
  0xd7   : > { %2664 = vrot.lane.b32.xlu1 %v2663_v41, %s2837_s11 }
  0xd8   : > { %2669 = vrot.lane.b32.xlu0 %v2638_v7, %s2834_s29  ;;  %v307_v7 = vld [vmem:[#allocation2 + $0xb0] sm:$0xff] }
  0xd9   : > { %v3426_v4 = vpop.permute.xlu1 %2384  ;;  %v3439_v23 = vpack.i.bf16 %v323_v22, %v307_v7  ;;  %v3450_v7 = vld [vmem:[#allocation2 + $0x16a] sm:$0xff] }
  0xda   : > { %v2390_v21 = vpop.permute.xlu0 %2389 }
  0xdb   : > { %2674 = vrot.lane.b32.xlu1 %v2673_v56, %s2838_s18  ;;  %v2392_v57 = vunpack.i.h.bf16 %v2390_v21  ;;  %v2391_v43 = vunpack.i.l.bf16 %v2390_v21  ;;  %v528_v56 = vld [vmem:[#allocation2 + $0xb1] sm:$0xff]  ;;  %v1510_v21 = vsel %vm1509_vm2, %v1477_v9, %v2331_v12 }
  0xdc   : > { %2679 = vrot.lane.b32.xlu0 %v2678_v26, %s2835_s5  ;;  %v3446_v14 = vpack.i.bf16 %v544_v63, %v528_v56 }
  0xdd   : > { %v2395_v15 = vpop.permute.xlu1 %2394  ;;  %v1543_v55 = vsel %vm1542_vm3, %v1510_v21, %v2391_v43  ;;  %v1559_v62 = vsel %vm1542_vm3, %v1526_v52, %v2392_v57  ;;  %v3462_v57 = vpack.i.bf16 %v513_v36, %v308_v13  ;;  %v2252_v43 = vunpack.i.h.bf16 %v3312_v38  ;;  %v3468_v21 = vld [vmem:[#allocation2 + $0xc8] sm:$0xff] }
  0xde   : > { %v2400_v16 = vpop.permute.xlu0 %2399  ;;  %v2397_v26 = vunpack.i.h.bf16 %v2395_v15  ;;  %v2396_v54 = vunpack.i.l.bf16 %v2395_v15 }
  0xdf   : > { %2684 = vrot.lane.b32.xlu1 %v2683_v11, %s2836_s6  ;;  %v3448_v11 = vld [vmem:[#allocation2 + $0xaa] sm:$0xff]  ;;  %v2401_v15 = vunpack.i.l.bf16 %v2400_v16 }
  0xe0   : > { %2689 = vrot.lane.b32.xlu0 %v2688_v20, %s2833_s20  ;;  %3970 = vst [vmem:[#allocation13_spill] sm:$0xff] %v3448_v11  ;;  %v2402_v20 = vunpack.i.h.bf16 %v2400_v16  ;;  %v1576_v9 = vsel %vm1575_vm4, %v1543_v55, %v2396_v54  ;;  %v1592_v24 = vsel %vm1575_vm4, %v1559_v62, %v2397_v26  ;;  %v2713_v52 = vpack.i.bf16 %v3450_v7, %v3448_v11  ;;  %v293_v26 = vld [vmem:[#allocation2 + $0x8] sm:$0xff] }
  0xe1   : > { %v2405_v32 = vpop.permute.xlu1 %2404  ;;  %v2292_v54 = vunpack.i.h.bf16 %v3342_v40  ;;  %v2332_v16 = vunpack.i.h.bf16 %v3371_v60  ;;  %v1609_v55 = vsel %vm1608_vm5, %v1576_v9, %v2401_v15  ;;  %v550_v60 = vld [vmem:[#allocation2 + $0x3a] sm:$0xff] }
  0xe2   : > { %v2410_v22 = vpop.permute.xlu0 %2409  ;;  %v2407_v12 = vunpack.i.h.bf16 %v2405_v32  ;;  %v2406_v63 = vunpack.i.l.bf16 %v2405_v32  ;;  %v2372_v32 = vunpack.i.h.bf16 %v3410_v35  ;;  %v1625_v13 = vsel %vm1608_vm5, %v1592_v24, %v2402_v20  ;;  %v566_v35 = vld [vmem:[#allocation2 + $0xfa] sm:$0xff] }
  0xe3   : > { %2694 = vrot.lane.b32.xlu1 %v3439_v23, %s2837_s11  ;;  %v2412_v36 = vunpack.i.h.bf16 %v2410_v22  ;;  %v2411_v62 = vunpack.i.l.bf16 %v2410_v22  ;;  %v529_v20 = vld [vmem:[#allocation2 + $0xc1] sm:$0xff]  ;;  %v1478_v22 = vsel %vm171_vm0, %v293_v26, %v2252_v43  ;;  %v1494_v24 = vsel %vm171_vm0, %v3468_v21, %v2292_v54 }
  0xe4   : > { %2699 = vrot.lane.b32.xlu0 %v2663_v41, %s2834_s29  ;;  %v1642_v38 = vsel %vm1641_vm6, %v1609_v55, %v2406_v63  ;;  %v1658_v40 = vsel %vm1641_vm6, %v1625_v13, %v2407_v12  ;;  %v545_v9 = vld [vmem:[#allocation2 + $0x181] sm:$0xff]  ;;  %v1511_v12 = vsel %vm1509_vm2, %v1478_v22, %v2332_v16  ;;  %v551_v22 = vld [vmem:[#allocation2 + $0x4a] sm:$0xff] }
  0xe5   : > { %v2415_v56 = vpop.permute.xlu1 %2414  ;;  %v3489_v54 = vpack.i.bf16 %v545_v9, %v529_v20 }
  0xe6   : > { %v2417_v41 = vunpack.i.h.bf16 %v2415_v56  ;;  %v2416_v29 = vunpack.i.l.bf16 %v2415_v56  ;;  %v2420_v10 = vpop.permute.xlu0 %2419 }
  0xe7   : > { %2704 = vrot.lane.b32.xlu1 %v3446_v14, %s2838_s18  ;;  %v2422_v11 = vunpack.i.h.bf16 %v2420_v10  ;;  %v2421_v3 = vunpack.i.l.bf16 %v2420_v10  ;;  %v1527_v10 = vsel %vm1509_vm2, %v1494_v24, %v2372_v32  ;;  %v2336_v24 = vunpack.i.l.bf16 %v3380_v49 }
  0xe8   : > { %2709 = vrot.lane.b32.xlu0 %v2708_v39, %s2835_s5  ;;  %v1675_v56 = vsel %vm1674_vm7, %v1642_v38, %v2416_v29  ;;  %v1691_v15 = vsel %vm1674_vm7, %v1658_v40, %v2417_v41  ;;  %v1544_v41 = vsel %vm1542_vm3, %v1511_v12, %v2411_v62  ;;  %v1560_v43 = vsel %vm1542_vm3, %v1527_v10, %v2412_v36  ;;  %v3495_v38 = vld [vmem:[#allocation2 + $0xb2] sm:$0xff] }
  0xe9   : > { %v2425_v63 = vpop.permute.xlu1 %2424  ;;  %1893 = vmatmul.mubr.f32.vlgmr.msra.gmra.mrb[0].mxu0 %v1675_v56  ;;  %1973 = vmatmul.mubr.f32.vlgmr.msra.gmra.mrb[0].mxu1 %v1691_v15  ;;  %v1577_v26 = vsel %vm1575_vm4, %v1544_v41, %v2421_v3  ;;  %v1593_v16 = vsel %vm1575_vm4, %v1560_v43, %v2422_v11  ;;  %v3497_v40 = vld [vmem:[#allocation2 + $0x172] sm:$0xff]  ;;  %v2256_v11 = vunpack.i.l.bf16 %v3320_v59  ;;  %v2296_v15 = vunpack.i.l.bf16 %v3346_v46 }
  0xea   : > { %v2427_v55 = vunpack.i.h.bf16 %v2425_v63  ;;  %v2426_v39 = vunpack.i.l.bf16 %v2425_v63  ;;  %v2430_v13 = vpop.permute.xlu0 %2429  ;;  %2151 = vmatprep.mubr.msk.f32.mxu0 %vm171_vm0, %v550_v60  ;;  %2167 = vmatprep.mubr.msk.f32.mxu1 %vm171_vm0, %v566_v35  ;;  %v2738_v3 = vpack.i.bf16 %v3497_v40, %v3495_v38  ;;  %v2376_v63 = vunpack.i.l.bf16 %v3416_v0 }
  0xeb   : > { %2714 = vrot.lane.b32.xlu1 %v2713_v52, %s2836_s6  ;;  %v2432_v32 = vunpack.i.h.bf16 %v2430_v13  ;;  %v2431_v29 = vunpack.i.l.bf16 %v2430_v13 }
  0xec   : > { %2719 = vrot.lane.b32.xlu0 %v3462_v57, %s2837_s11  ;;  %v1610_v36 = vsel %vm1608_vm5, %v1577_v26, %v2426_v39  ;;  %v1626_v52 = vsel %vm1608_vm5, %v1593_v16, %v2427_v55  ;;  %v514_v55 = vld [vmem:[#allocation2 + $0x188] sm:$0xff] }
  0xed   : > { %v2435_v62 = vpop.permute.xlu1 %2434  ;;  %v1643_v20 = vsel %vm1641_vm6, %v1610_v36, %v2431_v29  ;;  %v1659_v9 = vsel %vm1641_vm6, %v1626_v52, %v2432_v32  ;;  %v567_v39 = vld [vmem:[#allocation2 + $0x10a] sm:$0xff]  ;;  %v2743_v32 = vpack.i.bf16 %v3497_v40, %v3450_v7  ;;  %v1479_v29 = vsel %vm171_vm0, %v3177_v48, %v2256_v11  ;;  %v3533_v48 = vld [vmem:[#allocation2 + $0x182] sm:$0xff] }
  0xee   : > { %v2440_v60 = vpop.permute.xlu0 %2439  ;;  %v2437_v13 = vunpack.i.h.bf16 %v2435_v62  ;;  %v2436_v41 = vunpack.i.l.bf16 %v2435_v62  ;;  %v1495_v36 = vsel %vm171_vm0, %v3179_v50, %v2296_v15  ;;  %v3526_v62 = vpack.i.bf16 %v514_v55, %v3468_v21  ;;  %v530_v52 = vld [vmem:[#allocation2 + $0xc9] sm:$0xff] }
  0xef   : > { %v2442_v35 = vunpack.i.h.bf16 %v2440_v60  ;;  %v2441_v56 = vunpack.i.l.bf16 %v2440_v60  ;;  %2724 = vrot.lane.b32.xlu1 %v3439_v23, %s2834_s29  ;;  %v1528_v60 = vsel %vm1509_vm2, %v1495_v36, %v2376_v63  ;;  %v2297_v55 = vunpack.i.h.bf16 %v3346_v46 }
  0xf0   : > { %2729 = vrot.lane.b32.xlu0 %v3489_v54, %s2838_s18 }
  0xf1   : > { %v2445_v23 = vpop.permute.xlu1 %2444  ;;  %v1676_v12 = vsel %vm1674_vm7, %v1643_v20, %v2441_v56  ;;  %v1692_v10 = vsel %vm1674_vm7, %v1659_v9, %v2442_v35  ;;  %v546_v56 = vld [vmem:[#allocation2 + $0x189] sm:$0xff] }
  0xf2   : > { %v2450_v43 = vpop.permute.xlu0 %2449  ;;  %1898 = vmatmul.mubr.f32.gmra.mrb[2].mxu0 %v1676_v12  ;;  %1978 = vmatmul.mubr.f32.gmra.mrb[2].mxu1 %v1692_v10  ;;  %v2447_v26 = vunpack.i.h.bf16 %v2445_v23  ;;  %v2446_v16 = vunpack.i.l.bf16 %v2445_v23  ;;  %v3531_v20 = vld [vmem:[#allocation2 + $0xc2] sm:$0xff]  ;;  %v3542_v63 = vpack.i.bf16 %v546_v56, %v530_v52  ;;  %v2257_v10 = vunpack.i.h.bf16 %v3320_v59 }
  0xf3   : > { %2734 = vrot.lane.b32.xlu1 %v3446_v14, %s2835_s5  ;;  %2152 = vmatprep.mubr.msk.f32.mxu0 %vm171_vm0, %v551_v22  ;;  %v1512_v14 = vsel %vm1509_vm2, %v1479_v29, %v2336_v24  ;;  %v2452_v11 = vunpack.i.h.bf16 %v2450_v43  ;;  %v2451_v21 = vunpack.i.l.bf16 %v2450_v43  ;;  %v2768_v12 = vpack.i.bf16 %v3533_v48, %v3531_v20 }
  0xf4   : > { %2739 = vrot.lane.b32.xlu0 %v2738_v3, %s2836_s6  ;;  %2168 = vmatprep.mubr.msk.f32.mxu1 %vm171_vm0, %v567_v39  ;;  %v1545_v50 = vsel %vm1542_vm3, %v1512_v14, %v2436_v41  ;;  %v1561_v3 = vsel %vm1542_vm3, %v1528_v60, %v2437_v13  ;;  %v2337_v39 = vunpack.i.h.bf16 %v3380_v49  ;;  %v2377_v13 = vunpack.i.h.bf16 %v3416_v0  ;;  %v552_v49 = vld [vmem:[#allocation2 + $0x52] sm:$0xff] }
  0xf5   : > { %v2455_v35 = vpop.permute.xlu1 %2454  ;;  %v1578_v9 = vsel %vm1575_vm4, %v1545_v50, %v2446_v16  ;;  %v1594_v22 = vsel %vm1575_vm4, %v1561_v3, %v2447_v26  ;;  %v568_v14 = vld [vmem:[#allocation2 + $0x112] sm:$0xff] }
  0xf6   : > { %v2460_v15 = vpop.permute.xlu0 %2459  ;;  %v2457_v24 = vunpack.i.h.bf16 %v2455_v35  ;;  %v2456_v23 = vunpack.i.l.bf16 %v2455_v35  ;;  %v1627_v29 = vsel %vm1608_vm5, %v1594_v22, %v2452_v11  ;;  %v499_v50 = vld [vmem:[#allocation2 + $0xd8] sm:$0xff]  ;;  %v1496_v11 = vsel %vm171_vm0, %v3217_v19, %v2297_v55 }
  0xf7   : > { %2744 = vrot.lane.b32.xlu1 %v2743_v32, %s2833_s20  ;;  %v1611_v32 = vsel %vm1608_vm5, %v1578_v9, %v2451_v21  ;;  %v2462_v36 = vunpack.i.h.bf16 %v2460_v15  ;;  %v2461_v52 = vunpack.i.l.bf16 %v2460_v15  ;;  %v515_v3 = vld [vmem:[#allocation2 + $0x198] sm:$0xff]  ;;  %v1529_v9 = vsel %vm1509_vm2, %v1496_v11, %v2377_v13 }
  0xf8   : > { %2749 = vrot.lane.b32.xlu0 %v3526_v62, %s2837_s11  ;;  %v1644_v59 = vsel %vm1641_vm6, %v1611_v32, %v2456_v23  ;;  %v1660_v46 = vsel %vm1641_vm6, %v1627_v29, %v2457_v24  ;;  %v2773_v19 = vpack.i.bf16 %v515_v3, %v499_v50  ;;  %v2381_v50 = vunpack.i.l.bf16 %v3418_v34 }
  0xf9   : > { %v2465_v41 = vpop.permute.xlu1 %2464 }
  0xfa   : > { %v2467_v43 = vunpack.i.h.bf16 %v2465_v41  ;;  %v2466_v26 = vunpack.i.l.bf16 %v2465_v41  ;;  %v2470_v16 = vpop.permute.xlu0 %2469  ;;  %v1562_v41 = vsel %vm1542_vm3, %v1529_v9, %v2462_v36 }
  0xfb   : > { %2754 = vrot.lane.b32.xlu1 %v3462_v57, %s2834_s29  ;;  %v2472_v0 = vunpack.i.h.bf16 %v2470_v16  ;;  %v2471_v60 = vunpack.i.l.bf16 %v2470_v16  ;;  %v1480_v57 = vsel %vm171_vm0, %v3215_v17, %v2257_v10 }
  0xfc   : > { %2759 = vrot.lane.b32.xlu0 %v3542_v63, %s2838_s18  ;;  %v1677_v35 = vsel %vm1674_vm7, %v1644_v59, %v2466_v26  ;;  %v1693_v56 = vsel %vm1674_vm7, %v1660_v46, %v2467_v43  ;;  %v1513_v15 = vsel %vm1509_vm2, %v1480_v57, %v2337_v39  ;;  %v531_v43 = vld [vmem:[#allocation2 + $0xd9] sm:$0xff]  ;;  %v2261_v46 = vunpack.i.l.bf16 %v3318_v45 }
  0xfd   : > { %v2475_v21 = vpop.permute.xlu1 %2474  ;;  %1903 = vmatmul.mubr.f32.gmra.mrb[4].mxu0 %v1677_v35  ;;  %1983 = vmatmul.mubr.f32.gmra.mrb[4].mxu1 %v1693_v56  ;;  %v1546_v17 = vsel %vm1542_vm3, %v1513_v15, %v2461_v52  ;;  %v1595_v55 = vsel %vm1575_vm4, %v1562_v41, %v2472_v0  ;;  %v547_v26 = vld [vmem:[#allocation2 + $0x199] sm:$0xff]  ;;  %v3584_v0 = vld [vmem:[#allocation2 + $0xca] sm:$0xff]  ;;  %v553_v35 = vld [vmem:[#allocation2 + $0x62] sm:$0xff]  ;;  %v2341_v56 = vunpack.i.l.bf16 %v3382_v61 }
  0xfe   : > { %v2477_v22 = vunpack.i.h.bf16 %v2475_v21  ;;  %v2476_v24 = vunpack.i.l.bf16 %v2475_v21  ;;  %v2480_v23 = vpop.permute.xlu0 %2479  ;;  %2153 = vmatprep.mubr.msk.f32.mxu0 %vm171_vm0, %v552_v49  ;;  %2169 = vmatprep.mubr.msk.f32.mxu1 %vm171_vm0, %v568_v14  ;;  %v1579_v10 = vsel %vm1575_vm4, %v1546_v17, %v2471_v60  ;;  %v2301_v49 = vunpack.i.l.bf16 %v3348_v47  ;;  %v3586_v60 = vld [vmem:[#allocation2 + $0x18a] sm:$0xff]  ;;  %v500_v21 = vld [vmem:[#allocation2 + $0xe0] sm:$0xff] }
  0xff   : > { %2764 = vrot.lane.b32.xlu1 %v3489_v54, %s2835_s5  ;;  %v2482_v39 = vunpack.i.h.bf16 %v2480_v23  ;;  %v2481_v13 = vunpack.i.l.bf16 %v2480_v23  ;;  %v2783_v54 = vpack.i.bf16 %v547_v26, %v531_v43  ;;  %v569_v15 = vld [vmem:[#allocation2 + $0x122] sm:$0xff] }
 0x100   : > { %2769 = vrot.lane.b32.xlu0 %v2768_v12, %s2836_s6  ;;  %v1612_v32 = vsel %vm1608_vm5, %v1579_v10, %v2476_v24  ;;  %v1628_v29 = vsel %vm1608_vm5, %v1595_v55, %v2477_v22  ;;  %v532_v23 = vld [vmem:[#allocation2 + $0xe1] sm:$0xff]  ;;  %v2793_v10 = vpack.i.bf16 %v3586_v60, %v3584_v0  ;;  %v1481_v55 = vsel %vm171_vm0, %v3202_v1, %v2261_v46 }
 0x101   : > { %v2485_v16 = vpop.permute.xlu1 %2484  ;;  %v1645_v12 = vsel %vm1641_vm6, %v1612_v32, %v2481_v13  ;;  %v1661_v14 = vsel %vm1641_vm6, %v1628_v29, %v2482_v39  ;;  %v548_v41 = vld [vmem:[#allocation2 + $0x1a1] sm:$0xff]  ;;  %v1497_v39 = vsel %vm171_vm0, %v3204_v6, %v2301_v49  ;;  %v1514_v43 = vsel %vm1509_vm2, %v1481_v55, %v2341_v56 }
 0x102   : > { %v2490_v36 = vpop.permute.xlu0 %2489  ;;  %v2487_v9 = vunpack.i.h.bf16 %v2485_v16  ;;  %v2486_v22 = vunpack.i.l.bf16 %v2485_v16  ;;  %v1530_v26 = vsel %vm1509_vm2, %v1497_v39, %v2381_v50  ;;  %v2803_v32 = vpack.i.bf16 %v548_v41, %v532_v23 }
 0x103   : > { %v2492_v52 = vunpack.i.h.bf16 %v2490_v36  ;;  %v2491_v59 = vunpack.i.l.bf16 %v2490_v36  ;;  %2774 = vrot.lane.b32.xlu1 %v2773_v19, %s2837_s11  ;;  %v2262_v49 = vunpack.i.h.bf16 %v3318_v45 }
 0x104   : > { %2779 = vrot.lane.b32.xlu0 %v3526_v62, %s2834_s29  ;;  %v516_v62 = vld [vmem:[#allocation2 + $0x1a0] sm:$0xff]  ;;  %v1547_v29 = vsel %vm1542_vm3, %v1514_v43, %v2486_v22  ;;  %v1563_v36 = vsel %vm1542_vm3, %v1530_v26, %v2487_v9  ;;  %v554_v9 = vld [vmem:[#allocation2 + $0x6a] sm:$0xff] }
 0x105   : > { %v2495_v3 = vpop.permute.xlu1 %2494  ;;  %v1678_v57 = vsel %vm1674_vm7, %v1645_v12, %v2491_v59  ;;  %v1694_v11 = vsel %vm1674_vm7, %v1661_v14, %v2492_v52  ;;  %v2798_v13 = vpack.i.bf16 %v516_v62, %v500_v21  ;;  %v2302_v12 = vunpack.i.h.bf16 %v3348_v47 }
 0x106   : > { %v2500_v24 = vpop.permute.xlu0 %2499  ;;  %1908 = vmatmul.mubr.f32.gmra.mrb[6].mxu0 %v1678_v57  ;;  %1988 = vmatmul.mubr.f32.gmra.mrb[6].mxu1 %v1694_v11  ;;  %v2497_v17 = vunpack.i.h.bf16 %v2495_v3  ;;  %v2496_v19 = vunpack.i.l.bf16 %v2495_v3  ;;  %v2342_v14 = vunpack.i.h.bf16 %v3382_v61  ;;  %v570_v61 = vld [vmem:[#allocation2 + $0x12a] sm:$0xff]  ;;  %v1482_v41 = vsel %vm171_vm0, %v3245_v51, %v2262_v49 }
 0x107   : > { %2784 = vrot.lane.b32.xlu1 %v2783_v54, %s2838_s18  ;;  %2154 = vmatprep.mubr.msk.f32.mxu0 %vm171_vm0, %v553_v35  ;;  %v2502_v1 = vunpack.i.h.bf16 %v2500_v24  ;;  %v2501_v52 = vunpack.i.l.bf16 %v2500_v24  ;;  %v2382_v35 = vunpack.i.h.bf16 %v3418_v34 }
 0x108   : > { %2789 = vrot.lane.b32.xlu0 %v3542_v63, %s2835_s5  ;;  %2170 = vmatprep.mubr.msk.f32.mxu1 %vm171_vm0, %v569_v15  ;;  %v1580_v6 = vsel %vm1575_vm4, %v1547_v29, %v2496_v19  ;;  %v1596_v63 = vsel %vm1575_vm4, %v1563_v36, %v2497_v17  ;;  %v1498_v17 = vsel %vm171_vm0, %v3247_v53, %v2302_v12 }
 0x109   : > { %v2505_v16 = vpop.permute.xlu1 %2504  ;;  %v1613_v11 = vsel %vm1608_vm5, %v1580_v6, %v2501_v52  ;;  %v1629_v21 = vsel %vm1608_vm5, %v1596_v63, %v2502_v1  ;;  %v1531_v55 = vsel %vm1509_vm2, %v1498_v17, %v2382_v35  ;;  %v571_v35 = vld [vmem:[#allocation2 + $0x13a] sm:$0xff] }
 0x10a   : > { %v2510_v59 = vpop.permute.xlu0 %2509  ;;  %v2507_v54 = vunpack.i.h.bf16 %v2505_v16  ;;  %v2506_v46 = vunpack.i.l.bf16 %v2505_v16 }
 0x10b   : > { %2794 = vrot.lane.b32.xlu1 %v2793_v10, %s2836_s6  ;;  %v2512_v62 = vunpack.i.h.bf16 %v2510_v59  ;;  %v2511_v15 = vunpack.i.l.bf16 %v2510_v59  ;;  %v1515_v10 = vsel %vm1509_vm2, %v1482_v41, %v2342_v14  ;;  %v555_v14 = vld [vmem:[#allocation2 + $0x7a] sm:$0xff] }
 0x10c   : > { %2799 = vrot.lane.b32.xlu0 %v2798_v13, %s2837_s11  ;;  %v1646_v45 = vsel %vm1641_vm6, %v1613_v11, %v2506_v46  ;;  %v1662_v47 = vsel %vm1641_vm6, %v1629_v21, %v2507_v54  ;;  %v2266_v54 = vunpack.i.l.bf16 %v3325_v28  ;;  %v2306_v46 = vunpack.i.l.bf16 %v3352_v44 }
 0x10d   : > { %v2515_v56 = vpop.permute.xlu1 %2514  ;;  %v1548_v26 = vsel %vm1542_vm3, %v1515_v10, %v2511_v15  ;;  %v1564_v51 = vsel %vm1542_vm3, %v1531_v55, %v2512_v62 }
 0x10e   : > { %v2517_v50 = vunpack.i.h.bf16 %v2515_v56  ;;  %v2516_v3 = vunpack.i.l.bf16 %v2515_v56  ;;  %v2520_v57 = vpop.permute.xlu0 %2519  ;;  %v2346_v56 = vunpack.i.l.bf16 %v3388_v8 }
 0x10f   : > { %2804 = vrot.lane.b32.xlu1 %v2803_v32, %s2838_s18  ;;  %v2522_v22 = vunpack.i.h.bf16 %v2520_v57  ;;  %v2521_v34 = vunpack.i.l.bf16 %v2520_v57 }
 0x110   : > { %v1679_v24 = vsel %vm1674_vm7, %v1646_v45, %v2516_v3  ;;  %v1695_v23 = vsel %vm1674_vm7, %v1662_v47, %v2517_v50  ;;  %v2386_v50 = vunpack.i.l.bf16 %v3426_v4 }
 0x111   : > { %v2525_v19 = vpop.permute.xlu1 %2524  ;;  %1913 = vmatmul.mubr.f32.gmra.mrb[8].mxu0 %v1679_v24  ;;  %1993 = vmatmul.mubr.f32.gmra.mrb[8].mxu1 %v1695_v23  ;;  %v1581_v53 = vsel %vm1575_vm4, %v1548_v26, %v2521_v34  ;;  %v1597_v16 = vsel %vm1575_vm4, %v1564_v51, %v2522_v22 }
 0x112   : > { %v2527_v39 = vunpack.i.h.bf16 %v2525_v19  ;;  %v2526_v13 = vunpack.i.l.bf16 %v2525_v19  ;;  %v2530_v43 = vpop.permute.xlu0 %2529  ;;  %2155 = vmatprep.mubr.msk.f32.mxu0 %vm171_vm0, %v554_v9  ;;  %2171 = vmatprep.mubr.msk.f32.mxu1 %vm171_vm0, %v570_v61  ;;  %v1483_v9 = vsel %vm171_vm0, %v3265_v18, %v2266_v54  ;;  %v1499_v61 = vsel %vm171_vm0, %v3267_v31, %v2306_v46 }
 0x113   : > { %v2532_v32 = vunpack.i.h.bf16 %v2530_v43  ;;  %v2531_v29 = vunpack.i.l.bf16 %v2530_v43  ;;  %v1516_v22 = vsel %vm1509_vm2, %v1483_v9, %v2346_v56  ;;  %v1532_v34 = vsel %vm1509_vm2, %v1499_v61, %v2386_v50 }
 0x114   : > { %v1614_v1 = vsel %vm1608_vm5, %v1581_v53, %v2526_v13  ;;  %v1630_v52 = vsel %vm1608_vm5, %v1597_v16, %v2527_v39  ;;  %v2347_v46 = vunpack.i.h.bf16 %v3388_v8 }
 0x115   : > { %v2535_v36 = vpop.permute.xlu1 %2534  ;;  %v1647_v49 = vsel %vm1641_vm6, %v1614_v1, %v2531_v29  ;;  %v1663_v12 = vsel %vm1641_vm6, %v1630_v52, %v2532_v32 }
 0x116   : > { %v2540_v59 = vpop.permute.xlu0 %2539  ;;  %v2537_v21 = vunpack.i.h.bf16 %v2535_v36  ;;  %v2536_v62 = vunpack.i.l.bf16 %v2535_v36  ;;  %v556_v36 = vld [vmem:[#allocation2 + $0x82] sm:$0xff] }
 0x117   : > { %v2542_v6 = vunpack.i.h.bf16 %v2540_v59  ;;  %v2541_v63 = vunpack.i.l.bf16 %v2540_v59 }
 0x118   : > { %v1549_v23 = vsel %vm1542_vm3, %v1516_v22, %v2536_v62  ;;  %v1565_v41 = vsel %vm1542_vm3, %v1532_v34, %v2537_v21  ;;  %v2271_v62 = vunpack.i.l.bf16 %v3327_v2 }
 0x119   : > { %v2545_v3 = vpop.permute.xlu1 %2544  ;;  %v1680_v57 = vsel %vm1674_vm7, %v1647_v49, %v2541_v63  ;;  %v1696_v11 = vsel %vm1674_vm7, %v1663_v12, %v2542_v6  ;;  %v2267_v6 = vunpack.i.h.bf16 %v3325_v28  ;;  %v2307_v63 = vunpack.i.h.bf16 %v3352_v44 }
 0x11a   : > { %v2550_v15 = vpop.permute.xlu0 %2549  ;;  %1918 = vmatmul.mubr.f32.gmra.mrb[10].mxu0 %v1680_v57  ;;  %1998 = vmatmul.mubr.f32.gmra.mrb[10].mxu1 %v1696_v11  ;;  %v2547_v45 = vunpack.i.h.bf16 %v2545_v3  ;;  %v2546_v47 = vunpack.i.l.bf16 %v2545_v3  ;;  %v2387_v49 = vunpack.i.h.bf16 %v3426_v4 }
 0x11b   : > { %2156 = vmatprep.mubr.msk.f32.mxu0 %vm171_vm0, %v555_v14  ;;  %2172 = vmatprep.mubr.msk.f32.mxu1 %vm171_vm0, %v571_v35  ;;  %v2552_v17 = vunpack.i.h.bf16 %v2550_v15  ;;  %v2551_v19 = vunpack.i.l.bf16 %v2550_v15  ;;  %v1484_v28 = vsel %vm171_vm0, %v3275_v27, %v2267_v6  ;;  %v1500_v44 = vsel %vm171_vm0, %v3277_v5, %v2307_v63 }
 0x11c   : > { %v1582_v55 = vsel %vm1575_vm4, %v1549_v23, %v2546_v47  ;;  %v1598_v39 = vsel %vm1575_vm4, %v1565_v41, %v2547_v45  ;;  %v1533_v8 = vsel %vm1509_vm2, %v1500_v44, %v2387_v49  ;;  %v2311_v15 = vunpack.i.l.bf16 %v3354_v30  ;;  %v558_v44 = vld [vmem:[#allocation2 + $0x9a] sm:$0xff] }
 0x11d   : > { %v2555_v24 = vpop.permute.xlu1 %2554  ;;  %v1615_v53 = vsel %vm1608_vm5, %v1582_v55, %v2551_v19  ;;  %v1631_v16 = vsel %vm1608_vm5, %v1598_v39, %v2552_v17  ;;  %v2351_v47 = vunpack.i.l.bf16 %v3390_v42 }
 0x11e   : > { %v2560_v10 = vpop.permute.xlu0 %2559  ;;  %v2557_v18 = vunpack.i.h.bf16 %v2555_v24  ;;  %v2556_v13 = vunpack.i.l.bf16 %v2555_v24 }
 0x11f   : > { %v2562_v12 = vunpack.i.h.bf16 %v2560_v10  ;;  %v2561_v14 = vunpack.i.l.bf16 %v2560_v10 }
 0x120   : > { %v1648_v32 = vsel %vm1641_vm6, %v1615_v53, %v2556_v13  ;;  %v1664_v29 = vsel %vm1641_vm6, %v1631_v16, %v2557_v18  ;;  %v557_v18 = vld [vmem:[#allocation2 + $0x92] sm:$0xff]  ;;  %v1501_v53 = vsel %vm171_vm0, %v3295_v33, %v2311_v15 }
 0x121   : > { %v2565_v43 = vpop.permute.xlu1 %2564  ;;  %v1566_v45 = vsel %vm1542_vm3, %v1533_v8, %v2562_v12 }
 0x122   : > { %v2567_v31 = vunpack.i.h.bf16 %v2565_v43  ;;  %v2566_v26 = vunpack.i.l.bf16 %v2565_v43  ;;  %v2570_v51 = vpop.permute.xlu0 %2569 }
 0x123   : > { %v2572_v35 = vunpack.i.h.bf16 %v2570_v51  ;;  %v2571_v56 = vunpack.i.l.bf16 %v2570_v51  ;;  %v1485_v51 = vsel %vm171_vm0, %v3293_v58, %v2271_v62 }
 0x124   : > { %v1681_v1 = vsel %vm1674_vm7, %v1648_v32, %v2566_v26  ;;  %v1697_v52 = vsel %vm1674_vm7, %v1664_v29, %v2567_v31  ;;  %v1518_v32 = vsel %vm1509_vm2, %v1485_v51, %v2351_v47  ;;  %v2808_v47 = vld [vmem:[#allocation2 + $0x68] sm:$0xff] }
 0x125   : > { %v2575_v59 = vpop.permute.xlu1 %2574  ;;  %1923 = vmatmul.mubr.f32.gmra.mrb[12].mxu0 %v1681_v1  ;;  %2003 = vmatmul.mubr.f32.gmra.mrb[12].mxu1 %v1697_v52  ;;  %v1599_v9 = vsel %vm1575_vm4, %v1566_v45, %v2572_v35 }
 0x126   : > { %v3664_v54 = vpop.permute.xlu0 %2579  ;;  %2157 = vmatprep.mubr.msk.f32.mxu0 %vm171_vm0, %v556_v36  ;;  %2173 = vmatprep.mubr.msk.f32.mxu1 %vm171_vm0, %v3369_v25  ;;  %v2577_v3 = vunpack.i.h.bf16 %v2575_v59  ;;  %v2576_v57 = vunpack.i.l.bf16 %v2575_v59  ;;  %v1517_v25 = vsel %vm1509_vm2, %v1484_v28, %v2347_v46 }
 0x127   : > { %v1550_v27 = vsel %vm1542_vm3, %v1517_v25, %v2561_v14  ;;  %v2581_v61 = vunpack.i.l.bf16 %v3664_v54 }
 0x128   : > { %v1583_v5 = vsel %vm1575_vm4, %v1550_v27, %v2571_v56  ;;  %v1632_v17 = vsel %vm1608_vm5, %v1599_v9, %v2577_v3  ;;  %v2272_v3 = vunpack.i.h.bf16 %v3327_v2  ;;  %v3971_v27 = vld [vmem:[#allocation12_spill] sm:$0xff]  ;;  %v2809_v9 = vld [vmem:[#allocation2 + $0x128] sm:$0xff] }
 0x129   : > { %v2585_v50 = vpop.permute.xlu1 %2584  ;;  %v1616_v41 = vsel %vm1608_vm5, %v1583_v5, %v2576_v57  ;;  %v1534_v29 = vsel %vm1509_vm2, %v1501_v53, %v2581_v61  ;;  %v2312_v57 = vunpack.i.h.bf16 %v3354_v30  ;;  %v3972_v53 = vld [vmem:[#allocation3_spill] sm:$0xff] }
 0x12a   : > { %v2590_v11 = vpop.permute.xlu0 %2589  ;;  %v2587_v21 = vunpack.i.h.bf16 %v2585_v50  ;;  %v2586_v4 = vunpack.i.l.bf16 %v2585_v50  ;;  %v1486_v5 = vsel %vm171_vm0, %v2808_v47, %v2272_v3 }
 0x12b   : > { %v2592_v19 = vunpack.i.h.bf16 %v2590_v11  ;;  %v2591_v10 = vunpack.i.l.bf16 %v2590_v11 }
 0x12c   : > { %v1649_v55 = vsel %vm1641_vm6, %v1616_v41, %v2586_v4  ;;  %v1665_v39 = vsel %vm1641_vm6, %v1632_v17, %v2587_v21  ;;  %v2352_v21 = vunpack.i.h.bf16 %v3390_v42  ;;  %v2582_v4 = vunpack.i.h.bf16 %v3664_v54 }
 0x12d   : > { %v2595_v22 = vpop.permute.xlu1 %2594  ;;  %v1551_v58 = vsel %vm1542_vm3, %v1518_v32, %v2591_v10  ;;  %v1567_v59 = vsel %vm1542_vm3, %v1534_v29, %v2592_v19  ;;  %v1502_v42 = vsel %vm171_vm0, %v2809_v9, %v2312_v57  ;;  %v3973_v32 = vld [vmem:[#allocation6_spill] sm:$0xff] }
 0x12e   : > { %v2597_v34 = vunpack.i.h.bf16 %v2595_v22  ;;  %v2596_v24 = vunpack.i.l.bf16 %v2595_v22  ;;  %v2600_v23 = vpop.permute.xlu0 %2599  ;;  %v1519_v54 = vsel %vm1509_vm2, %v1486_v5, %v2352_v21  ;;  %v1535_v22 = vsel %vm1509_vm2, %v1502_v42, %v2582_v4 }
 0x12f   : > { %v2602_v13 = vunpack.i.h.bf16 %v2600_v23  ;;  %v2601_v43 = vunpack.i.l.bf16 %v2600_v23  ;;  %v2316_v29 = vunpack.i.l.bf16 %v3973_v32 }
 0x130   : > { %v1682_v31 = vsel %vm1674_vm7, %v1649_v55, %v2596_v24  ;;  %v1698_v26 = vsel %vm1674_vm7, %v1665_v39, %v2597_v34 }
 0x131   : > { %v2605_v16 = vpop.permute.xlu1 %2604  ;;  %1928 = vmatmul.mubr.f32.gmra.mrb[14].mxu0 %v1682_v31  ;;  %2008 = vmatmul.mubr.f32.gmra.mrb[14].mxu1 %v1698_v26  ;;  %v1584_v33 = vsel %vm1575_vm4, %v1551_v58, %v2601_v43  ;;  %v1600_v6 = vsel %vm1575_vm4, %v1567_v59, %v2602_v13 }
 0x132   : > { %v2607_v36 = vunpack.i.h.bf16 %v2605_v16  ;;  %v2606_v1 = vunpack.i.l.bf16 %v2605_v16  ;;  %v2610_v52 = vpop.permute.xlu0 %2609  ;;  %2158 = vmatprep.mubr.msk.f32.mxu0 %vm171_vm0, %v557_v18  ;;  %2174 = vmatprep.mubr.msk.f32.mxu1 %vm171_vm0, %v3396_v37  ;;  %v2276_v16 = vunpack.i.l.bf16 %v3972_v53 }
 0x133   : > { %v2612_v63 = vunpack.i.h.bf16 %v2610_v52  ;;  %v2611_v46 = vunpack.i.l.bf16 %v2610_v52  ;;  %v3974_v52 = vld [vmem:[#allocation9_spill] sm:$0xff] }
 0x134   : > { %v1617_v12 = vsel %vm1608_vm5, %v1584_v33, %v2606_v1  ;;  %v1633_v14 = vsel %vm1608_vm5, %v1600_v6, %v2607_v36  ;;  %v2356_v58 = vunpack.i.l.bf16 %v3974_v52 }
 0x135   : > { %v2615_v49 = vpop.permute.xlu1 %2614  ;;  %v1650_v37 = vsel %vm1641_vm6, %v1617_v12, %v2611_v46  ;;  %v1666_v28 = vsel %vm1641_vm6, %v1633_v14, %v2612_v63 }
 0x136   : > { %v2620_v35 = vpop.permute.xlu0 %2619  ;;  %v2617_v15 = vunpack.i.h.bf16 %v2615_v49  ;;  %v2616_v45 = vunpack.i.l.bf16 %v2615_v49 }
 0x137   : > { %v2622_v56 = vunpack.i.h.bf16 %v2620_v35  ;;  %v2621_v50 = vunpack.i.l.bf16 %v2620_v35 }
 0x138   : > { %v1552_v24 = vsel %vm1542_vm3, %v1519_v54, %v2616_v45  ;;  %v1568_v23 = vsel %vm1542_vm3, %v1535_v22, %v2617_v15 }
 0x139   : > { %v2625_v11 = vpop.permute.xlu1 %2624  ;;  %v1683_v25 = vsel %vm1674_vm7, %v1650_v37, %v2621_v50  ;;  %v1699_v8 = vsel %vm1674_vm7, %v1666_v28, %v2622_v56  ;;  %v3975_v56 = vld [vmem:[#allocation13_spill] sm:$0xff]  ;;  %v2810_v50 = vld [vmem:[#allocation2 + $0x78] sm:$0xff] }
 0x13a   : > { %v2630_v62 = vpop.permute.xlu0 %2629  ;;  %1933 = vmatmul.mubr.f32.gmra.mrb[16].mxu0 %v1683_v25  ;;  %2013 = vmatmul.mubr.f32.gmra.mrb[16].mxu1 %v1699_v8  ;;  %v2627_v2 = vunpack.i.h.bf16 %v2625_v11  ;;  %v2626_v30 = vunpack.i.l.bf16 %v2625_v11  ;;  %v1487_v37 = vsel %vm171_vm0, %v2810_v50, %v2276_v16  ;;  %v2811_v28 = vld [vmem:[#allocation2 + $0x138] sm:$0xff] }
 0x13b   : > { %2159 = vmatprep.mubr.msk.f32.mxu0 %vm171_vm0, %v558_v44  ;;  %2175 = vmatprep.mubr.msk.f32.mxu1 %vm171_vm0, %v3971_v27  ;;  %v2632_v41 = vunpack.i.h.bf16 %v2630_v62  ;;  %v2631_v17 = vunpack.i.l.bf16 %v2630_v62  ;;  %v1503_v44 = vsel %vm171_vm0, %v2811_v28, %v2316_v29  ;;  %v1520_v3 = vsel %vm1509_vm2, %v1487_v37, %v2356_v58 }
 0x13c   : > { %v1585_v19 = vsel %vm1575_vm4, %v1552_v24, %v2626_v30  ;;  %v1601_v10 = vsel %vm1575_vm4, %v1568_v23, %v2627_v2 }
 0x13d   : > { %v3719_v61 = vpop.permute.xlu1 %2634  ;;  %v1618_v26 = vsel %vm1608_vm5, %v1585_v19, %v2631_v17  ;;  %v1634_v51 = vsel %vm1608_vm5, %v1601_v10, %v2632_v41  ;;  %v2277_v41 = vunpack.i.h.bf16 %v3972_v53  ;;  %v2317_v17 = vunpack.i.h.bf16 %v3973_v32  ;;  %v2813_v53 = vld [vmem:[#allocation2 + $0x140] sm:$0xff] }
 0x13e   : > { %v2640_v34 = vpop.permute.xlu0 %2639  ;;  %v2636_v59 = vunpack.i.l.bf16 %v3719_v61  ;;  %v2357_v10 = vunpack.i.h.bf16 %v3974_v52  ;;  %v3976_v52 = vld [vmem:[#allocation4_spill] sm:$0xff] }
 0x13f   : > { %v2642_v55 = vunpack.i.h.bf16 %v2640_v34  ;;  %v2641_v39 = vunpack.i.l.bf16 %v2640_v34  ;;  %v1504_v16 = vsel %vm171_vm0, %v2813_v53, %v2317_v17  ;;  %v2281_v58 = vunpack.i.l.bf16 %v3976_v52 }
 0x140   : > { %v1536_v57 = vsel %vm1509_vm2, %v1503_v44, %v2636_v59  ;;  %v3977_v59 = vld [vmem:[#allocation7_spill] sm:$0xff] }
 0x141   : > { %v2645_v18 = vpop.permute.xlu1 %2644  ;;  %v1651_v36 = vsel %vm1641_vm6, %v1618_v26, %v2641_v39  ;;  %v1667_v1 = vsel %vm1641_vm6, %v1634_v51, %v2642_v55  ;;  %v2637_v55 = vunpack.i.h.bf16 %v3719_v61  ;;  %v2812_v26 = vld [vmem:[#allocation2 + $0x80] sm:$0xff] }
 0x142   : > { %v2650_v13 = vpop.permute.xlu0 %2649  ;;  %v2647_v46 = vunpack.i.h.bf16 %v2645_v18  ;;  %v2646_v49 = vunpack.i.l.bf16 %v2645_v18  ;;  %v1488_v51 = vsel %vm171_vm0, %v2812_v26, %v2277_v41  ;;  %v2322_v26 = vunpack.i.h.bf16 %v3977_v59 }
 0x143   : > { %v2652_v43 = vunpack.i.h.bf16 %v2650_v13  ;;  %v2651_v31 = vunpack.i.l.bf16 %v2650_v13 }
 0x144   : > { %v1553_v25 = vsel %vm1542_vm3, %v1520_v3, %v2646_v49  ;;  %v1569_v8 = vsel %vm1542_vm3, %v1536_v57, %v2647_v46  ;;  %v3978_v46 = vld [vmem:[#allocation10_spill] sm:$0xff] }
 0x145   : > { %v2655_v33 = vpop.permute.xlu1 %2654  ;;  %v1684_v6 = vsel %vm1674_vm7, %v1651_v36, %v2651_v31  ;;  %v1700_v63 = vsel %vm1674_vm7, %v1667_v1, %v2652_v43  ;;  %v1537_v36 = vsel %vm1509_vm2, %v1504_v16, %v2637_v55  ;;  %v2361_v49 = vunpack.i.l.bf16 %v3978_v46 }
 0x146   : > { %v2660_v12 = vpop.permute.xlu0 %2659  ;;  %1938 = vmatmul.mubr.f32.gmra.mrb[18].mxu0 %v1684_v6  ;;  %2018 = vmatmul.mubr.f32.gmra.mrb[18].mxu1 %v1700_v63  ;;  %v2657_v14 = vunpack.i.h.bf16 %v2655_v33  ;;  %v2656_v35 = vunpack.i.l.bf16 %v2655_v33  ;;  %v2321_v33 = vunpack.i.l.bf16 %v3977_v59  ;;  %v2817_v59 = vld [vmem:[#allocation2 + $0x158] sm:$0xff] }
 0x147   : > { %2160 = vmatprep.mubr.msk.f32.mxu0 %vm171_vm0, %v3975_v56  ;;  %2176 = vmatprep.mubr.msk.f32.mxu1 %vm171_vm0, %v3450_v7  ;;  %v2662_v21 = vunpack.i.h.bf16 %v2660_v12  ;;  %v2661_v4 = vunpack.i.l.bf16 %v2660_v12 }
 0x148   : > { %v1586_v7 = vsel %vm1575_vm4, %v1553_v25, %v2656_v35  ;;  %v1602_v15 = vsel %vm1575_vm4, %v1569_v8, %v2657_v14 }
 0x149   : > { %v2665_v11 = vpop.permute.xlu1 %2664  ;;  %v1619_v9 = vsel %vm1608_vm5, %v1586_v7, %v2661_v4  ;;  %v1635_v42 = vsel %vm1608_vm5, %v1602_v15, %v2662_v21  ;;  %v2814_v15 = vld [vmem:[#allocation2 + $0x90] sm:$0xff] }
 0x14a   : > { %v2670_v62 = vpop.permute.xlu0 %2669  ;;  %v2667_v45 = vunpack.i.h.bf16 %v2665_v11  ;;  %v2666_v27 = vunpack.i.l.bf16 %v2665_v11 }
 0x14b   : > { %v2672_v39 = vunpack.i.h.bf16 %v2670_v62  ;;  %v2671_v18 = vunpack.i.l.bf16 %v2670_v62 }
 0x14c   : > { %v1652_v54 = vsel %vm1641_vm6, %v1619_v9, %v2666_v27  ;;  %v1668_v22 = vsel %vm1641_vm6, %v1635_v42, %v2667_v45  ;;  %v1489_v45 = vsel %vm171_vm0, %v2814_v15, %v2281_v58  ;;  %v2815_v27 = vld [vmem:[#allocation2 + $0x150] sm:$0xff] }
 0x14d   : > { %v2675_v2 = vpop.permute.xlu1 %2674  ;;  %v1570_v6 = vsel %vm1542_vm3, %v1537_v36, %v2672_v39 }
 0x14e   : > { %v2677_v30 = vunpack.i.h.bf16 %v2675_v2  ;;  %v2676_v47 = vunpack.i.l.bf16 %v2675_v2  ;;  %v2680_v5 = vpop.permute.xlu0 %2679  ;;  %v1505_v2 = vsel %vm171_vm0, %v2815_v27, %v2321_v33  ;;  %v1506_v33 = vsel %vm171_vm0, %v2817_v59, %v2322_v26 }
 0x14f   : > { %v2682_v13 = vunpack.i.h.bf16 %v2680_v5  ;;  %v2681_v43 = vunpack.i.l.bf16 %v2680_v5 }
 0x150   : > { %v1685_v34 = vsel %vm1674_vm7, %v1652_v54, %v2676_v47  ;;  %v1701_v24 = vsel %vm1674_vm7, %v1668_v22, %v2677_v30  ;;  %v1522_v47 = vsel %vm1509_vm2, %v1489_v45, %v2361_v49 }
 0x151   : > { %v2685_v23 = vpop.permute.xlu1 %2684  ;;  %1943 = vmatmul.mubr.f32.gmra.mrb[20].mxu0 %v1685_v34  ;;  %2023 = vmatmul.mubr.f32.gmra.mrb[20].mxu1 %v1701_v24  ;;  %v1603_v14 = vsel %vm1575_vm4, %v1570_v6, %v2682_v13 }
 0x152   : > { %v3757_v19 = vpop.permute.xlu0 %2689  ;;  %2161 = vmatprep.mubr.msk.f32.mxu0 %vm171_vm0, %v3495_v38  ;;  %2177 = vmatprep.mubr.msk.f32.mxu1 %vm171_vm0, %v3497_v40  ;;  %v2687_v32 = vunpack.i.h.bf16 %v2685_v23  ;;  %v2686_v38 = vunpack.i.l.bf16 %v2685_v23  ;;  %v1521_v40 = vsel %vm1509_vm2, %v1488_v51, %v2357_v10 }
 0x153   : > { %v1554_v63 = vsel %vm1542_vm3, %v1521_v40, %v2671_v18  ;;  %v2691_v35 = vunpack.i.l.bf16 %v3757_v19 }
 0x154   : > { %v1587_v12 = vsel %vm1575_vm4, %v1554_v63, %v2681_v43  ;;  %v1636_v3 = vsel %vm1608_vm5, %v1603_v14, %v2687_v32  ;;  %v2362_v32 = vunpack.i.h.bf16 %v3978_v46 }
 0x155   : > { %v2695_v31 = vpop.permute.xlu1 %2694  ;;  %v1620_v44 = vsel %vm1608_vm5, %v1587_v12, %v2686_v38  ;;  %v1538_v5 = vsel %vm1509_vm2, %v1505_v2, %v2691_v35  ;;  %v2692_v38 = vunpack.i.h.bf16 %v3757_v19  ;;  %v563_v2 = vld [vmem:[#allocation2 + $0xda] sm:$0xff] }
 0x156   : > { %v2700_v29 = vpop.permute.xlu0 %2699  ;;  %v2697_v1 = vunpack.i.h.bf16 %v2695_v31  ;;  %v2696_v61 = vunpack.i.l.bf16 %v2695_v31  ;;  %v2282_v31 = vunpack.i.h.bf16 %v3976_v52  ;;  %v2816_v52 = vld [vmem:[#allocation2 + $0x98] sm:$0xff] }
 0x157   : > { %v2702_v57 = vunpack.i.h.bf16 %v2700_v29  ;;  %v2701_v11 = vunpack.i.l.bf16 %v2700_v29  ;;  %v1539_v63 = vsel %vm1509_vm2, %v1506_v33, %v2692_v38 }
 0x158   : > { %v1653_v25 = vsel %vm1641_vm6, %v1620_v44, %v2696_v61  ;;  %v1669_v8 = vsel %vm1641_vm6, %v1636_v3, %v2697_v1  ;;  %v1490_v58 = vsel %vm171_vm0, %v2816_v52, %v2282_v31  ;;  %v3980_v3 = vld [vmem:[#allocation8_spill] sm:$0xff] }
 0x159   : > { %v2705_v56 = vpop.permute.xlu1 %2704  ;;  %v1555_v22 = vsel %vm1542_vm3, %v1522_v47, %v2701_v11  ;;  %v1571_v34 = vsel %vm1542_vm3, %v1538_v5, %v2702_v57  ;;  %v1523_v6 = vsel %vm1509_vm2, %v1490_v58, %v2362_v32  ;;  %v2326_v57 = vunpack.i.l.bf16 %v3980_v3 }
 0x15a   : > { %v2707_v50 = vunpack.i.h.bf16 %v2705_v56  ;;  %v2706_v37 = vunpack.i.l.bf16 %v2705_v56  ;;  %v2710_v28 = vpop.permute.xlu0 %2709  ;;  %v2327_v38 = vunpack.i.h.bf16 %v3980_v3 }
 0x15b   : > { %v2712_v21 = vunpack.i.h.bf16 %v2710_v28  ;;  %v2711_v4 = vunpack.i.l.bf16 %v2710_v28  ;;  %v3979_v28 = vld [vmem:[#allocation5_spill] sm:$0xff] }
 0x15c   : > { %v1686_v62 = vsel %vm1674_vm7, %v1653_v25, %v2706_v37  ;;  %v1702_v7 = vsel %vm1674_vm7, %v1669_v8, %v2707_v50  ;;  %v2286_v44 = vunpack.i.l.bf16 %v3979_v28  ;;  %v2287_v32 = vunpack.i.h.bf16 %v3979_v28 }
 0x15d   : > { %v2715_v30 = vpop.permute.xlu1 %2714  ;;  %1948 = vmatmul.mubr.f32.gmra.mrb[22].mxu0 %v1686_v62  ;;  %2028 = vmatmul.mubr.f32.gmra.mrb[22].mxu1 %v1702_v7  ;;  %v1588_v24 = vsel %vm1575_vm4, %v1555_v22, %v2711_v4  ;;  %v1604_v23 = vsel %vm1575_vm4, %v1571_v34, %v2712_v21  ;;  %v3981_v62 = vld [vmem:[#allocation11_spill] sm:$0xff] }
 0x15e   : > { %v2717_v9 = vunpack.i.h.bf16 %v2715_v30  ;;  %v2716_v42 = vunpack.i.l.bf16 %v2715_v30  ;;  %v2720_v54 = vpop.permute.xlu0 %2719  ;;  %2162 = vmatprep.mubr.msk.f32.mxu0 %vm171_vm0, %v3531_v20  ;;  %2178 = vmatprep.mubr.msk.f32.mxu1 %vm171_vm0, %v3533_v48  ;;  %v2366_v7 = vunpack.i.l.bf16 %v3981_v62  ;;  %v579_v30 = vld [vmem:[#allocation2 + $0x19a] sm:$0xff] }
 0x15f   : > { %v2722_v41 = vunpack.i.h.bf16 %v2720_v54  ;;  %v2721_v17 = vunpack.i.l.bf16 %v2720_v54 }
 0x160   : > { %v1621_v55 = vsel %vm1608_vm5, %v1588_v24, %v2716_v42  ;;  %v1637_v39 = vsel %vm1608_vm5, %v1604_v23, %v2717_v9  ;;  %v2818_v23 = vld [vmem:[#allocation2 + $0xa8] sm:$0xff] }
 0x161   : > { %v2725_v10 = vpop.permute.xlu1 %2724  ;;  %v1654_v48 = vsel %vm1641_vm6, %v1621_v55, %v2721_v17  ;;  %v1670_v43 = vsel %vm1641_vm6, %v1637_v39, %v2722_v41  ;;  %v1491_v41 = vsel %vm171_vm0, %v2818_v23, %v2286_v44  ;;  %v2819_v17 = vld [vmem:[#allocation2 + $0x168] sm:$0xff] }
 0x162   : > { %v2730_v18 = vpop.permute.xlu0 %2729  ;;  %v2727_v40 = vunpack.i.h.bf16 %v2725_v10  ;;  %v2726_v36 = vunpack.i.l.bf16 %v2725_v10  ;;  %v1507_v10 = vsel %vm171_vm0, %v2819_v17, %v2326_v57  ;;  %v1524_v55 = vsel %vm1509_vm2, %v1491_v41, %v2366_v7 }
 0x163   : > { %v2732_v20 = vunpack.i.h.bf16 %v2730_v18  ;;  %v2731_v13 = vunpack.i.l.bf16 %v2730_v18 }
 0x164   : > { %v1572_v49 = vsel %vm1542_vm3, %v1539_v63, %v2727_v40 }
 0x165   : > { %v2735_v51 = vpop.permute.xlu1 %2734  ;;  %v1687_v53 = vsel %vm1674_vm7, %v1654_v48, %v2731_v13  ;;  %v1703_v16 = vsel %vm1674_vm7, %v1670_v43, %v2732_v20 }
 0x166   : > { %v2740_v29 = vpop.permute.xlu0 %2739  ;;  %1953 = vmatmul.mubr.f32.gmra.mrb[24].mxu0 %v1687_v53  ;;  %2033 = vmatmul.mubr.f32.gmra.mrb[24].mxu1 %v1703_v16  ;;  %v2737_v1 = vunpack.i.h.bf16 %v2735_v51  ;;  %v2736_v61 = vunpack.i.l.bf16 %v2735_v51 }
 0x167   : > { %2163 = vmatprep.mubr.msk.f32.mxu0 %vm171_vm0, %v3584_v0  ;;  %2179 = vmatprep.mubr.msk.f32.mxu1 %vm171_vm0, %v3586_v60  ;;  %v1556_v0 = vsel %vm1542_vm3, %v1523_v6, %v2726_v36  ;;  %v2742_v60 = vunpack.i.h.bf16 %v2740_v29  ;;  %v2741_v12 = vunpack.i.l.bf16 %v2740_v29  ;;  %v2367_v29 = vunpack.i.h.bf16 %v3981_v62 }
 0x168   : > { %v1589_v14 = vsel %vm1575_vm4, %v1556_v0, %v2736_v61  ;;  %v1605_v35 = vsel %vm1575_vm4, %v1572_v49, %v2737_v1 }
 0x169   : > { %v3811_v19 = vpop.permute.xlu1 %2744  ;;  %v1622_v21 = vsel %vm1608_vm5, %v1589_v14, %v2741_v12  ;;  %v1638_v4 = vsel %vm1608_vm5, %v1605_v35, %v2742_v60  ;;  %v564_v60 = vld [vmem:[#allocation2 + $0xe2] sm:$0xff]  ;;  %v2820_v14 = vld [vmem:[#allocation2 + $0xb0] sm:$0xff] }
 0x16a   : > { %v2750_v46 = vpop.permute.xlu0 %2749  ;;  %v2746_v15 = vunpack.i.l.bf16 %v3811_v19  ;;  %v2747_v40 = vunpack.i.h.bf16 %v3811_v19  ;;  %v580_v12 = vld [vmem:[#allocation2 + $0x1a2] sm:$0xff]  ;;  %v1492_v19 = vsel %vm171_vm0, %v2820_v14, %v2287_v32  ;;  %v2821_v35 = vld [vmem:[#allocation2 + $0x170] sm:$0xff] }
 0x16b   : > { %v2752_v56 = vunpack.i.h.bf16 %v2750_v46  ;;  %v2751_v50 = vunpack.i.l.bf16 %v2750_v46  ;;  %v1525_v28 = vsel %vm1509_vm2, %v1492_v19, %v2367_v29 }
 0x16c   : > { %v1540_v39 = vsel %vm1509_vm2, %v1507_v10, %v2746_v15 }
 0x16d   : > { %v2755_v37 = vpop.permute.xlu1 %2754  ;;  %v1655_v45 = vsel %vm1641_vm6, %v1622_v21, %v2751_v50  ;;  %v1671_v27 = vsel %vm1641_vm6, %v1638_v4, %v2752_v56  ;;  %v1508_v56 = vsel %vm171_vm0, %v2821_v35, %v2327_v38 }
 0x16e   : > { %v2760_v11 = vpop.permute.xlu0 %2759  ;;  %v2757_v47 = vunpack.i.h.bf16 %v2755_v37  ;;  %v2756_v5 = vunpack.i.l.bf16 %v2755_v37  ;;  %v1541_v44 = vsel %vm1509_vm2, %v1508_v56, %v2747_v40 }
 0x16f   : > { %v2762_v25 = vunpack.i.h.bf16 %v2760_v11  ;;  %v2761_v8 = vunpack.i.l.bf16 %v2760_v11 }
 0x170   : > { %v1557_v18 = vsel %vm1542_vm3, %v1524_v55, %v2756_v5  ;;  %v1573_v20 = vsel %vm1542_vm3, %v1540_v39, %v2757_v47 }
 0x171   : > { %v2765_v9 = vpop.permute.xlu1 %2764  ;;  %v1688_v42 = vsel %vm1674_vm7, %v1655_v45, %v2761_v8  ;;  %v1704_v54 = vsel %vm1674_vm7, %v1671_v27, %v2762_v25 }
 0x172   : > { %v2767_v22 = vunpack.i.h.bf16 %v2765_v9  ;;  %v2766_v34 = vunpack.i.l.bf16 %v2765_v9  ;;  %v2770_v24 = vpop.permute.xlu0 %2769  ;;  %1958 = vmatmul.mubr.f32.gmra.mrb[26].mxu0 %v1688_v42  ;;  %2038 = vmatmul.mubr.f32.gmra.mrb[26].mxu1 %v1704_v54 }
 0x173   : > { %2164 = vmatprep.mubr.msk.f32.mxu0 %vm171_vm0, %v563_v2  ;;  %2180 = vmatprep.mubr.msk.f32.mxu1 %vm171_vm0, %v579_v30  ;;  %v2772_v13 = vunpack.i.h.bf16 %v2770_v24  ;;  %v2771_v48 = vunpack.i.l.bf16 %v2770_v24 }
 0x174   : > { %v1590_v31 = vsel %vm1575_vm4, %v1557_v18, %v2766_v34  ;;  %v1606_v26 = vsel %vm1575_vm4, %v1573_v20, %v2767_v22  ;;  %v3868_v22 = vld [vmem:[%s3946_s2] ss:$0 sm:$0xff] }
 0x175   : > { %v2775_v43 = vpop.permute.xlu1 %2774  ;;  %v1623_v1 = vsel %vm1608_vm5, %v1590_v31, %v2771_v48  ;;  %v1639_v61 = vsel %vm1608_vm5, %v1606_v26, %v2772_v13 }
 0x176   : > { %v2780_v51 = vpop.permute.xlu0 %2779  ;;  %v2777_v53 = vunpack.i.h.bf16 %v2775_v43  ;;  %v2776_v16 = vunpack.i.l.bf16 %v2775_v43 }
 0x177   : > { %v2782_v52 = vunpack.i.h.bf16 %v2780_v51  ;;  %v2781_v58 = vunpack.i.l.bf16 %v2780_v51 }
 0x178   : > { %v1656_v0 = vsel %vm1641_vm6, %v1623_v1, %v2776_v16  ;;  %v1672_v49 = vsel %vm1641_vm6, %v1639_v61, %v2777_v53 }
 0x179   : > { %v2785_v36 = vpop.permute.xlu1 %2784  ;;  %v1574_v57 = vsel %vm1542_vm3, %v1541_v44, %v2782_v52  ;;  %v1558_v11 = vsel %vm1542_vm3, %v1525_v28, %v2781_v58 }
 0x17a   : > { %v2787_v59 = vunpack.i.h.bf16 %v2785_v36  ;;  %v2786_v33 = vunpack.i.l.bf16 %v2785_v36  ;;  %v2790_v6 = vpop.permute.xlu0 %2789 }
 0x17b   : > { %v2792_v63 = vunpack.i.h.bf16 %v2790_v6  ;;  %v2791_v46 = vunpack.i.l.bf16 %v2790_v6 }
 0x17c   : > { %v1689_v50 = vsel %vm1674_vm7, %v1656_v0, %v2786_v33  ;;  %v1705_v37 = vsel %vm1674_vm7, %v1672_v49, %v2787_v59 }
 0x17d   : > { %v2795_v3 = vpop.permute.xlu1 %2794  ;;  %1963 = vmatmul.mubr.f32.gmra.mrb[28].mxu0 %v1689_v50  ;;  %2043 = vmatmul.mubr.f32.gmra.mrb[28].mxu1 %v1705_v37  ;;  %v1591_v4 = vsel %vm1575_vm4, %v1558_v11, %v2791_v46  ;;  %v1607_v62 = vsel %vm1575_vm4, %v1574_v57, %v2792_v63 }
 0x17e   : > { %v2797_v25 = vunpack.i.h.bf16 %v2795_v3  ;;  %v2796_v8 = vunpack.i.l.bf16 %v2795_v3  ;;  %v2800_v21 = vpop.permute.xlu0 %2799  ;;  %2165 = vmatprep.mubr.msk.f32.mxu0 %vm171_vm0, %v564_v60  ;;  %2181 = vmatprep.mubr.msk.f32.mxu1 %vm171_vm0, %v580_v12 }
 0x17f   : > { %v2802_v7 = vunpack.i.h.bf16 %v2800_v21  ;;  %v2801_v15 = vunpack.i.l.bf16 %v2800_v21 }
 0x180   : > { %v1624_v45 = vsel %vm1608_vm5, %v1591_v4, %v2796_v8  ;;  %v1640_v27 = vsel %vm1608_vm5, %v1607_v62, %v2797_v25 }
 0x181   : > { %v2805_v2 = vpop.permute.xlu1 %2804  ;;  %v1657_v5 = vsel %vm1641_vm6, %v1624_v45, %v2801_v15  ;;  %v1673_v9 = vsel %vm1641_vm6, %v1640_v27, %v2802_v7 }
 0x182   : > { %v2807_v30 = vunpack.i.h.bf16 %v2805_v2  ;;  %v2806_v47 = vunpack.i.l.bf16 %v2805_v2 }
 0x184   : > { %v1690_v42 = vsel %vm1674_vm7, %v1657_v5, %v2806_v47  ;;  %v1706_v54 = vsel %vm1674_vm7, %v1673_v9, %v2807_v30 }
 0x185   : > { %1968 = vmatmul.mubr.f32.gmra.mrb[30].mxu0 %v1690_v42  ;;  %2048 = vmatmul.mubr.f32.gmra.mrb[30].mxu1 %v1706_v54 }
 0x1bc   : > { %v1894_v34 = vpop.f32.mrb[0].mxu0  ;;  %v1974_v24 = vpop.f32.mrb[0].mxu1 }
 0x1bd   : > { %v1895_v23 = vadd.f32 %v3868_v22, %v1894_v34  ;;  %v1975_v41 = vadd.f32 %v3868_v22, %v1974_v24  ;;  %v1896_v17 = vpop.f32.mrb[1].mxu0  ;;  %v1976_v10 = vpop.f32.mrb[1].mxu1 }
 0x1bf   : > { %2053 = vst [vmem:[%s3875_s19] sm:$0xff] %v1895_v23  ;;  %2069 = vst [vmem:[%s3875_s19 + $0x80] sm:$0xff] %v1975_v41 }
 0x1c5   : > { %v1899_v55 = vpop.f32.mrb[2].mxu0  ;;  %v1979_v39 = vpop.f32.mrb[2].mxu1 }
 0x1c6   : > { %v1900_v18 = vadd.f32 %v3868_v22, %v1899_v55  ;;  %v1980_v20 = vadd.f32 %v3868_v22, %v1979_v39  ;;  %v1901_v13 = vpop.f32.mrb[3].mxu0  ;;  %v1981_v48 = vpop.f32.mrb[3].mxu1 }
 0x1c8   : > { %2054 = vst [vmem:[%s3875_s19 + $0x8] sm:$0xff] %v1900_v18  ;;  %2070 = vst [vmem:[%s3875_s19 + $0x88] sm:$0xff] %v1980_v20 }
 0x1d0   : > { %v1904_v43 = vpop.f32.mrb[4].mxu0  ;;  %v1984_v31 = vpop.f32.mrb[4].mxu1 }
 0x1d1   : > { %v1905_v26 = vadd.f32 %v3868_v22, %v1904_v43  ;;  %v1985_v51 = vadd.f32 %v3868_v22, %v1984_v31  ;;  %v1906_v53 = vpop.f32.mrb[5].mxu0  ;;  %v1986_v16 = vpop.f32.mrb[5].mxu1 }
 0x1d3   : > { %2055 = vst [vmem:[%s3875_s19 + $0x10] sm:$0xff] %v1905_v26  ;;  %2071 = vst [vmem:[%s3875_s19 + $0x90] sm:$0xff] %v1985_v51 }
 0x1d9   : > { %v1909_v32 = vpop.f32.mrb[6].mxu0  ;;  %v1989_v38 = vpop.f32.mrb[6].mxu1 }
 0x1da   : > { %v1910_v29 = vadd.f32 %v3868_v22, %v1909_v32  ;;  %v1990_v40 = vadd.f32 %v3868_v22, %v1989_v38  ;;  %v1911_v36 = vpop.f32.mrb[7].mxu0  ;;  %v1991_v1 = vpop.f32.mrb[7].mxu1 }
 0x1dc   : > { %2056 = vst [vmem:[%s3875_s19 + $0x18] sm:$0xff] %v1910_v29  ;;  %2072 = vst [vmem:[%s3875_s19 + $0x98] sm:$0xff] %v1990_v40 }
 0x1e4   : > { %v1914_v61 = vpop.f32.mrb[8].mxu0  ;;  %v1994_v52 = vpop.f32.mrb[8].mxu1 }
 0x1e5   : > { %v1915_v58 = vadd.f32 %v3868_v22, %v1914_v61  ;;  %v1995_v59 = vadd.f32 %v3868_v22, %v1994_v52  ;;  %v1916_v33 = vpop.f32.mrb[9].mxu0  ;;  %v1996_v6 = vpop.f32.mrb[9].mxu1 }
 0x1e7   : > { %2057 = vst [vmem:[%s3875_s19 + $0x20] sm:$0xff] %v1915_v58  ;;  %2073 = vst [vmem:[%s3875_s19 + $0xa0] sm:$0xff] %v1995_v59 }
 0x1ed   : > { %v1919_v63 = vpop.f32.mrb[10].mxu0  ;;  %v1999_v46 = vpop.f32.mrb[10].mxu1 }
 0x1ee   : > { %v1920_v0 = vadd.f32 %v3868_v22, %v1919_v63  ;;  %v2000_v49 = vadd.f32 %v3868_v22, %v1999_v46  ;;  %v1921_v60 = vpop.f32.mrb[11].mxu0  ;;  %v2001_v12 = vpop.f32.mrb[11].mxu1 }
 0x1f0   : > { %2058 = vst [vmem:[%s3875_s19 + $0x28] sm:$0xff] %v1920_v0  ;;  %2074 = vst [vmem:[%s3875_s19 + $0xa8] sm:$0xff] %v2000_v49 }
 0x1f8   : > { %v1924_v14 = vpop.f32.mrb[12].mxu0  ;;  %v2004_v19 = vpop.f32.mrb[12].mxu1 }
 0x1f9   : > { %v1925_v35 = vadd.f32 %v3868_v22, %v1924_v14  ;;  %v2005_v56 = vadd.f32 %v3868_v22, %v2004_v19  ;;  %v1926_v50 = vpop.f32.mrb[13].mxu0  ;;  %v2006_v37 = vpop.f32.mrb[13].mxu1 }
 0x1fb   : > { %2059 = vst [vmem:[%s3875_s19 + $0x30] sm:$0xff] %v1925_v35  ;;  %2075 = vst [vmem:[%s3875_s19 + $0xb0] sm:$0xff] %v2005_v56 }
 0x204   : > { %v1929_v28 = vpop.f32.mrb[14].mxu0  ;;  %v2009_v44 = vpop.f32.mrb[14].mxu1 }
 0x205   : > { %v1930_v3 = vadd.f32 %v3868_v22, %v1929_v28  ;;  %v2010_v57 = vadd.f32 %v3868_v22, %v2009_v44  ;;  %v1931_v11 = vpop.f32.mrb[15].mxu0  ;;  %v2011_v25 = vpop.f32.mrb[15].mxu1 }
 0x207   : > { %2060 = vst [vmem:[%s3875_s19 + $0x38] sm:$0xff] %v1930_v3  ;;  %2076 = vst [vmem:[%s3875_s19 + $0xb8] sm:$0xff] %v2010_v57 }
 0x20d   : > { %v1934_v8 = vpop.f32.mrb[16].mxu0  ;;  %v2014_v21 = vpop.f32.mrb[16].mxu1 }
 0x20e   : > { %v1935_v4 = vadd.f32 %v3868_v22, %v1934_v8  ;;  %v2015_v62 = vadd.f32 %v3868_v22, %v2014_v21  ;;  %v1936_v7 = vpop.f32.mrb[17].mxu0  ;;  %v2016_v15 = vpop.f32.mrb[17].mxu1 }
 0x210   : > { %2061 = vst [vmem:[%s3875_s19 + $0x40] sm:$0xff] %v1935_v4  ;;  %2077 = vst [vmem:[%s3875_s19 + $0xc0] sm:$0xff] %v2015_v62 }
 0x219   : > { %v1939_v45 = vpop.f32.mrb[18].mxu0  ;;  %v2019_v27 = vpop.f32.mrb[18].mxu1 }
 0x21a   : > { %v1940_v2 = vadd.f32 %v3868_v22, %v1939_v45  ;;  %v2020_v30 = vadd.f32 %v3868_v22, %v2019_v27  ;;  %v1941_v47 = vpop.f32.mrb[19].mxu0  ;;  %v2021_v5 = vpop.f32.mrb[19].mxu1 }
 0x21c   : > { %2062 = vst [vmem:[%s3875_s19 + $0x48] sm:$0xff] %v1940_v2  ;;  %2078 = vst [vmem:[%s3875_s19 + $0xc8] sm:$0xff] %v2020_v30 }
 0x224   : > { %v1944_v9 = vpop.f32.mrb[20].mxu0  ;;  %v2024_v42 = vpop.f32.mrb[20].mxu1 }
 0x225   : > { %v1945_v54 = vadd.f32 %v3868_v22, %v1944_v9  ;;  %v2025_v34 = vadd.f32 %v3868_v22, %v2024_v42  ;;  %v1946_v24 = vpop.f32.mrb[21].mxu0  ;;  %v2026_v23 = vpop.f32.mrb[21].mxu1 }
 0x227   : > { %2063 = vst [vmem:[%s3875_s19 + $0x50] sm:$0xff] %v1945_v54  ;;  %2079 = vst [vmem:[%s3875_s19 + $0xd0] sm:$0xff] %v2025_v34 }
 0x230   : > { %v1949_v41 = vpop.f32.mrb[22].mxu0  ;;  %v2029_v17 = vpop.f32.mrb[22].mxu1 }
 0x231   : > { %v1950_v10 = vadd.f32 %v3868_v22, %v1949_v41  ;;  %v2030_v55 = vadd.f32 %v3868_v22, %v2029_v17  ;;  %v1951_v39 = vpop.f32.mrb[23].mxu0  ;;  %v2031_v18 = vpop.f32.mrb[23].mxu1 }
 0x233   : > { %2064 = vst [vmem:[%s3875_s19 + $0x58] sm:$0xff] %v1950_v10  ;;  %2080 = vst [vmem:[%s3875_s19 + $0xd8] sm:$0xff] %v2030_v55 }
 0x239   : > { %v1954_v20 = vpop.f32.mrb[24].mxu0  ;;  %v2034_v13 = vpop.f32.mrb[24].mxu1 }
 0x23a   : > { %v1955_v48 = vadd.f32 %v3868_v22, %v1954_v20  ;;  %v2035_v43 = vadd.f32 %v3868_v22, %v2034_v13  ;;  %v1956_v31 = vpop.f32.mrb[25].mxu0  ;;  %v2036_v26 = vpop.f32.mrb[25].mxu1 }
 0x23c   : > { %2065 = vst [vmem:[%s3875_s19 + $0x60] sm:$0xff] %v1955_v48  ;;  %2081 = vst [vmem:[%s3875_s19 + $0xe0] sm:$0xff] %v2035_v43 }
 0x245   : > { %v1959_v51 = vpop.f32.mrb[26].mxu0  ;;  %v2039_v53 = vpop.f32.mrb[26].mxu1 }
 0x246   : > { %v1960_v16 = vadd.f32 %v3868_v22, %v1959_v51  ;;  %v2040_v32 = vadd.f32 %v3868_v22, %v2039_v53  ;;  %v1961_v38 = vpop.f32.mrb[27].mxu0  ;;  %v2041_v29 = vpop.f32.mrb[27].mxu1 }
 0x248   : > { %2066 = vst [vmem:[%s3875_s19 + $0x68] sm:$0xff] %v1960_v16  ;;  %2082 = vst [vmem:[%s3875_s19 + $0xe8] sm:$0xff] %v2040_v32 }
 0x250   : > { %v1964_v40 = vpop.f32.mrb[28].mxu0  ;;  %v2044_v36 = vpop.f32.mrb[28].mxu1 }
 0x251   : > { %v1965_v1 = vadd.f32 %v3868_v22, %v1964_v40  ;;  %v2045_v61 = vadd.f32 %v3868_v22, %v2044_v36  ;;  %v1966_v52 = vpop.f32.mrb[29].mxu0  ;;  %v2046_v58 = vpop.f32.mrb[29].mxu1 }
 0x253   : > { %2067 = vst [vmem:[%s3875_s19 + $0x70] sm:$0xff] %v1965_v1  ;;  %2083 = vst [vmem:[%s3875_s19 + $0xf0] sm:$0xff] %v2045_v61 }
 0x258   : > { %v1969_v59 = vpop.f32.mrb[30].mxu0  ;;  %v2049_v33 = vpop.f32.mrb[30].mxu1 }
 0x259   : > { %v1970_v6 = vadd.f32 %v3868_v22, %v1969_v59  ;;  %v2050_v63 = vadd.f32 %v3868_v22, %v2049_v33  ;;  %v1971_v46 = vpop.f32.mrb[31].mxu0  ;;  %v2051_v0 = vpop.f32.mrb[31].mxu1 }
 0x25b   : > { %2068 = vst [vmem:[%s3875_s19 + $0x78] sm:$0xff] %v1970_v6  ;;  %2084 = vst [vmem:[%s3875_s19 + $0xf8] sm:$0xff] %v2050_v63 }
 0x25c PF: > { %s13_s12 = sadd.s32 1, %s2828_s12  }
 0x25d   : > { %p10_p4 = scmp.ge.s32.totalorder %s13_s12, 4  }
 0x25f   :  { %12 = sbr.rel (!%p10_p4) target bundleno = 1 (0x1), region = 64 }

</bundles_post_ra>
